<compile_context>
chip_gen: v7x
topology: tpu7x:2x2x1
jax: 0.10.0
libtpu: 0.0.40
codegen_flags: <defaults>
</compile_context>

<pallas_src>
import functools
import math

import jax
import jax.numpy as jnp
from jax.experimental import pallas as pl
from jax.experimental.pallas import tpu as pltpu


# ---------------------------------------------------------------------------
# Kernel 1: per-head Q/K/V projection (runs once per token tile).
# ---------------------------------------------------------------------------
def qkv_proj_kernel(x_ref, wq_ref, bq_ref, wk_ref, bk_ref, wv_ref, bv_ref,
                    qh_ref, kh_ref, vh_ref, *, num_heads):
    TS, D = x_ref.shape[1], x_ref.shape[2]
    H = num_heads
    dk = D // H
    x_bf = x_ref[0].astype(jnp.bfloat16)                 # (TS, D)

    def proj(w_ref, b_ref):
        y = jnp.dot(x_bf, w_ref[...],
                    preferred_element_type=jnp.float32) + b_ref[0]     # (TS, D) f32
        # head-split relayout done ONCE here instead of per attention step
        return y.reshape(TS, H, dk).transpose(1, 0, 2).astype(jnp.bfloat16)

    qh_ref[0] = proj(wq_ref, bq_ref)   # W_q / b_q pre-scaled by 1/sqrt(d_k)
    kh_ref[0] = proj(wk_ref, bk_ref)
    vh_ref[0] = proj(wv_ref, bv_ref)


# ---------------------------------------------------------------------------
# Kernel 2: flash attention (online softmax) + W_o + LN1 + FFN + LN2.
# grid = (B, n_q, n_k); scratch carries the online-softmax state across ki.
# ---------------------------------------------------------------------------
def encoder_core_kernel(x_ref, mask_ref, qh_ref, kh_ref, vh_ref,
                        woh_ref, bo_ref, g1_ref, beta1_ref,
                        w1_ref, bf1_ref, w2_ref, bf2_ref, g2_ref, beta2_ref,
                        out_ref, m_sc, l_sc, acc_sc):
    ki = pl.program_id(2)
    H = qh_ref.shape[1]
    D = x_ref.shape[2]
    eps = jnp.float32(1e-5)
    inv_d = jnp.float32(1.0 / D)

    @pl.when(ki == 0)
    def _():
        m_sc[...] = jnp.full(m_sc.shape, -jnp.inf, jnp.float32)
        l_sc[...] = jnp.zeros(l_sc.shape, jnp.float32)
        acc_sc[...] = jnp.zeros(acc_sc.shape, jnp.float32)

    # ---- online-softmax attention step for this (query tile, key tile) ----
    qh = qh_ref[0]                                       # (H, TQ, dk) bf16 (pre-scaled)
    kh = kh_ref[0]                                       # (H, TK, dk) bf16
    vh = vh_ref[0]                                       # (H, TK, dk) bf16

    s = jnp.einsum('hqd,hkd->hqk', qh, kh,
                   preferred_element_type=jnp.float32)   # (H, TQ, TK) f32
    keep = mask_ref[0]                                   # (TQ, TK) int8, nonzero = keep
    bias = jnp.where(keep == 0, jnp.float32(-1e9), jnp.float32(0.0))
    s = s + bias[None, :, :]

    m_prev = m_sc[...]
    m_new = jnp.maximum(m_prev, jnp.max(s, axis=-1, keepdims=True))
    alpha = jnp.exp(m_prev - m_new)
    p = jnp.exp(s - m_new)                               # unnormalized probabilities
    l_sc[...] = alpha * l_sc[...] + jnp.sum(p, axis=-1, keepdims=True)
    acc_sc[...] = alpha * acc_sc[...] + jnp.einsum(
        'hqk,hkd->hqd', p.astype(jnp.bfloat16), vh,
        preferred_element_type=jnp.float32)
    m_sc[...] = m_new

    # ---- finalize on the last key tile: W_o, LN1, FFN, LN2 ----
    @pl.when(ki == pl.num_programs(2) - 1)
    def _():
        # normalize AFTER PV: (H, TQ, dk) multiply instead of (H, TQ, S)
        o = (acc_sc[...] * pl.reciprocal(l_sc[...], approx=True)).astype(jnp.bfloat16)
        # output projection: per-head batched matmul against (H, dk, D) W_o,
        # then an explicit head-sum -- no transpose / reshape relayout.
        tmp = jnp.einsum('hqd,hdf->hqf', o, woh_ref[...],
                         preferred_element_type=jnp.float32)            # (H, TQ, D)
        attn = tmp[0]
        for h in range(1, H):
            attn = attn + tmp[h]
        attn = attn + bo_ref[0]                                          # (TQ, D)

        # residual + LayerNorm 1 (single fused sum / sum-of-squares pass;
        # E[x^2]-E[x]^2 cancellation is acceptable at the test tolerance)
        x_q = x_ref[0]
        h1 = x_q + attn
        mu1 = jnp.sum(h1, axis=-1, keepdims=True) * inv_d
        ms1 = jnp.sum(h1 * h1, axis=-1, keepdims=True) * inv_d
        x1 = (h1 - mu1) * jax.lax.rsqrt(ms1 - mu1 * mu1 + eps) * g1_ref[0] + beta1_ref[0]

        # position-wise feed-forward (bf16 MXU inputs, f32 accumulation)
        ff = jnp.dot(x1.astype(jnp.bfloat16), w1_ref[...],
                     preferred_element_type=jnp.float32) + bf1_ref[0]
        ff = jnp.maximum(ff, 0.0)
        ff = jnp.dot(ff.astype(jnp.bfloat16), w2_ref[...],
                     preferred_element_type=jnp.float32) + bf2_ref[0]

        # residual + LayerNorm 2
        h2 = x1 + ff
        mu2 = jnp.sum(h2, axis=-1, keepdims=True) * inv_d
        ms2 = jnp.sum(h2 * h2, axis=-1, keepdims=True) * inv_d
        out_ref[0] = ((h2 - mu2) * jax.lax.rsqrt(ms2 - mu2 * mu2 + eps)
                      * g2_ref[0] + beta2_ref[0])


# ---------------------------------------------------------------------------
# Wrapper
# ---------------------------------------------------------------------------
def _vmem_capacity_bytes():
    try:
        return int(pltpu.get_tpu_info().vmem_capacity_bytes)
    except Exception:
        return 128 * 1024 * 1024   # conservative default (v5e/v6e size)


def _prepare_weights(params, num_heads, scale):
    D = params["wq"].shape[0]
    dk = D // num_heads
    bf = jnp.bfloat16
    return {
        # 1/sqrt(d_k) folded into W_q / b_q (fused into the bf16 cast).
        "wq": (params["wq"] * scale).astype(bf),
        "bq": (params["bq"] * scale).astype(jnp.float32),
        "wk": params["wk"].astype(bf), "bk": params["bk"],
        "wv": params["wv"].astype(bf), "bv": params["bv"],
        "wo_h": params["wo"].reshape(num_heads, dk, D).astype(bf),
        "bo": params["bo"],
        "g1": params["g1"], "beta1": params["beta1"],
        "w1": params["w1"].astype(bf), "bf1": params["bf1"],
        "w2": params["w2"].astype(bf), "bf2": params["bf2"],
        "g2": params["g2"], "beta2": params["beta2"],
    }


def _encoder_layer_impl(x, mask_i8, w, num_heads, TQ, TK, vmem_limit, single_buffer):
    B, S, D = x.shape
    H = num_heads
    dk = D // H
    n_q = S // TQ
    n_k = S // TK

    def const_spec(arr):
        # Constant-index weight: DMA'd once; single-buffer when supported.
        idx = lambda *_: (0,) * arr.ndim
        if single_buffer:
            return pl.BlockSpec(arr.shape, idx, pipeline_mode=pl.Buffered(1))
        return pl.BlockSpec(arr.shape, idx)

    # ---- kernel 1: Q/K/V projections, once per token tile ----
    proj_weights = [w["wq"], w["bq"], w["wk"], w["bk"], w["wv"], w["bv"]]
    qh, kh, vh = pl.pallas_call(
        functools.partial(qkv_proj_kernel, num_heads=H),
        out_shape=(
            jax.ShapeDtypeStruct((B, H, S, dk), jnp.bfloat16),
            jax.ShapeDtypeStruct((B, H, S, dk), jnp.bfloat16),
            jax.ShapeDtypeStruct((B, H, S, dk), jnp.bfloat16),
        ),
        grid_spec=pltpu.PrefetchScalarGridSpec(
            num_scalar_prefetch=0,
            grid=(B, n_q),
            in_specs=[pl.BlockSpec((1, TQ, D), lambda b, si: (b, si, 0))]
                     + [const_spec(a) for a in proj_weights],
            out_specs=(pl.BlockSpec((1, H, TQ, dk), lambda b, si: (b, 0, si, 0)),) * 3,
        ),
        compiler_params=pltpu.CompilerParams(
            dimension_semantics=("parallel", "parallel"),
            vmem_limit_bytes=vmem_limit),
    )(x, *proj_weights)

    # ---- kernel 2: flash attention + W_o + LN1 + FFN + LN2 ----
    core_weights = [w["wo_h"], w["bo"], w["g1"], w["beta1"],
                    w["w1"], w["bf1"], w["w2"], w["bf2"], w["g2"], w["beta2"]]
    out = pl.pallas_call(
        encoder_core_kernel,
        out_shape=jax.ShapeDtypeStruct((B, S, D), jnp.float32),
        grid_spec=pltpu.PrefetchScalarGridSpec(
            num_scalar_prefetch=0,
            grid=(B, n_q, n_k),
            in_specs=[
                pl.BlockSpec((1, TQ, D), lambda b, qi, ki: (b, qi, 0)),     # x (residual)
                pl.BlockSpec((1, TQ, TK), lambda b, qi, ki: (b, qi, ki)),   # mask tile
                pl.BlockSpec((1, H, TQ, dk), lambda b, qi, ki: (b, 0, qi, 0)),  # Q heads
                pl.BlockSpec((1, H, TK, dk), lambda b, qi, ki: (b, 0, ki, 0)),  # K heads
                pl.BlockSpec((1, H, TK, dk), lambda b, qi, ki: (b, 0, ki, 0)),  # V heads
            ] + [const_spec(a) for a in core_weights],
            out_specs=pl.BlockSpec((1, TQ, D), lambda b, qi, ki: (b, qi, 0)),
            scratch_shapes=[
                pltpu.VMEM((H, TQ, 1), jnp.float32),    # running max
                pltpu.VMEM((H, TQ, 1), jnp.float32),    # running sum
                pltpu.VMEM((H, TQ, dk), jnp.float32),   # unnormalized PV accumulator
            ]),
        compiler_params=pltpu.CompilerParams(
            dimension_semantics=("parallel", "parallel", "arbitrary"),
            vmem_limit_bytes=vmem_limit),
    )(x, mask_i8, qh, kh, vh, *core_weights)
    return out


def encoder_layer(x, mask, params, num_heads, *, q_tile=None, k_tile=256):
    B, S, D = x.shape
    assert D % num_heads == 0
    dk = D // num_heads

    vmem_cap = _vmem_capacity_bytes()
    # ~40 MiB scoped on 64 MiB parts (v7x); ~80 MiB on 128 MiB parts (v5e/v6e).
    vmem_limit = min((vmem_cap * 5) // 8, 96 * 1024 * 1024)
    if q_tile is None:
        q_tile = 256 if vmem_cap >= 100 * 1024 * 1024 else 128

    TQ = S if S <= q_tile else q_tile
    TK = S if S <= k_tile else k_tile
    assert S % TQ == 0 and S % TK == 0, "S must be divisible by the query/key tiles"

    w = _prepare_weights(params, num_heads, 1.0 / math.sqrt(dk))
    # "nonzero == keep" preserves masked_fill(mask == 0, -1e9) semantics even
    # for non-binary masks, while keeping the DMA 4x smaller than f32.
    mask_keep = (mask != 0).astype(jnp.int8)

    try:
        return jax.block_until_ready(
            _encoder_layer_impl(x, mask_keep, w, num_heads, TQ, TK, vmem_limit, True))
    except Exception:
        # pl.Buffered(1) (single-buffered constant weights) unsupported on this
        # jax/libtpu combo -> retry with default double-buffered weight specs.
        return jax.block_until_ready(
            _encoder_layer_impl(x, mask_keep, w, num_heads, TQ, TK, vmem_limit, False))


# ---------------------------------------------------------------------------
# Pure-JAX f32 reference matching the PyTorch forward (eval mode).
# ---------------------------------------------------------------------------
def encoder_layer_ref(x, mask, params, num_heads):
    B, S, D = x.shape
    d_k = D // num_heads

    def ln(h, g, b):
        mu = jnp.mean(h, axis=-1, keepdims=True)
        var = jnp.mean((h - mu) ** 2, axis=-1, keepdims=True)
        return (h - mu) / jnp.sqrt(var + 1e-5) * g + b

    q = x @ params["wq"] + params["bq"]
    k = x @ params["wk"] + params["bk"]
    v = x @ params["wv"] + params["bv"]

    def split(t):
        return t.reshape(B, S, num_heads, d_k).transpose(0, 2, 1, 3)

    qh, kh, vh = split(q), split(k), split(v)
    s = jnp.einsum("bhqd,bhkd->bhqk", qh, kh) / math.sqrt(d_k)
    s = jnp.where(mask[:, None, :, :] == 0, -1e9, s)
    p = jax.nn.softmax(s, axis=-1)
    attn = jnp.einsum("bhqk,bhkd->bhqd", p, vh)
    attn = attn.transpose(0, 2, 1, 3).reshape(B, S, D)
    attn = attn @ params["wo"] + params["bo"]

    x1 = ln(x + attn, params["g1"], params["beta1"])
    ff = jnp.maximum(x1 @ params["w1"] + params["bf1"], 0.0) @ params["w2"] + params["bf2"]
    return ln(x1 + ff, params["g2"], params["beta2"])


def init_params(key, d_model, d_ff):
    ks = jax.random.split(key, 8)
    s = 0.02

    def lin(k, fin, fout):
        return (s * jax.random.normal(k, (fin, fout), jnp.float32),
                jnp.zeros((1, fout), jnp.float32))

    wq, bq = lin(ks[0], d_model, d_model)
    wk, bk = lin(ks[1], d_model, d_model)
    wv, bv = lin(ks[2], d_model, d_model)
    wo, bo = lin(ks[3], d_model, d_model)
    w1, bf1 = lin(ks[4], d_model, d_ff)
    w2, bf2 = lin(ks[5], d_ff, d_model)
    bq = bq + 0.01
    bf1 = bf1 + 0.01
    return {
        "wq": wq, "bq": bq, "wk": wk, "bk": bk, "wv": wv, "bv": bv,
        "wo": wo, "bo": bo,
        "g1": jnp.ones((1, d_model), jnp.float32),
        "beta1": jnp.zeros((1, d_model), jnp.float32),
        "w1": w1, "bf1": bf1, "w2": w2, "bf2": bf2,
        "g2": jnp.ones((1, d_model), jnp.float32),
        "beta2": jnp.zeros((1, d_model), jnp.float32),
    }


if __name__ == "__main__":
    B, S, D, H, FF = 2, 8, 32, 4, 64
    key = jax.random.PRNGKey(0)
    kx, kp = jax.random.split(key)

    x = jax.random.normal(kx, (B, S, D), jnp.float32)
    # causal mask (B, S, S): 1 = keep, 0 = masked (-1e9)
    mask = jnp.broadcast_to(jnp.tril(jnp.ones((S, S), jnp.float32)), (B, S, S))
    params = init_params(kp, D, FF)

    out = encoder_layer(x, mask, params, H)
    out = jax.block_until_ready(out)

    ref = encoder_layer_ref(x, mask, params, H)
    assert out.shape == (B, S, D)
    # bf16 MXU inputs (f32 accumulation) -> looser tolerance than pure f32.
    assert jnp.allclose(out, ref, rtol=2e-2, atol=2e-2), "mismatch vs reference"

    print("KERNEL_OK")
</pallas_src>

<mosaic_0001>
module attributes {stable_mosaic.version = 11 : i64} {
  func.func @qkv_proj_kernel(%arg0: i32, %arg1: i32, %arg2: memref<1x8x32xf32, #tpu.memory_space<vmem>>, %arg3: memref<32x32xbf16, #tpu.memory_space<vmem>>, %arg4: memref<1x32xf32, #tpu.memory_space<vmem>>, %arg5: memref<32x32xbf16, #tpu.memory_space<vmem>>, %arg6: memref<1x32xf32, #tpu.memory_space<vmem>>, %arg7: memref<32x32xbf16, #tpu.memory_space<vmem>>, %arg8: memref<1x32xf32, #tpu.memory_space<vmem>>, %arg9: memref<1x4x8x8xbf16, #tpu.memory_space<vmem>>, %arg10: memref<1x4x8x8xbf16, #tpu.memory_space<vmem>>, %arg11: memref<1x4x8x8xbf16, #tpu.memory_space<vmem>>) attributes {dimension_semantics = [#tpu.dimension_semantics<parallel>, #tpu.dimension_semantics<parallel>], iteration_bounds = array<i64: 2, 1>, scalar_prefetch = 0 : i64, scratch_operands = 0 : i64, tpu.core_type = #tpu.core_type<tc>, window_params = [{transform_indices = @transform_0, window_bounds = array<i64: 1, 8, 32>}, {pipeline_mode = #tpu.pipeline_mode<synchronous>, transform_indices = @transform_1, window_bounds = array<i64: 32, 32>}, {pipeline_mode = #tpu.pipeline_mode<synchronous>, transform_indices = @transform_2, window_bounds = array<i64: 1, 32>}, {pipeline_mode = #tpu.pipeline_mode<synchronous>, transform_indices = @transform_3, window_bounds = array<i64: 32, 32>}, {pipeline_mode = #tpu.pipeline_mode<synchronous>, transform_indices = @transform_4, window_bounds = array<i64: 1, 32>}, {pipeline_mode = #tpu.pipeline_mode<synchronous>, transform_indices = @transform_5, window_bounds = array<i64: 32, 32>}, {pipeline_mode = #tpu.pipeline_mode<synchronous>, transform_indices = @transform_6, window_bounds = array<i64: 1, 32>}, {transform_indices = @transform_7, window_bounds = array<i64: 1, 4, 8, 8>}, {transform_indices = @transform_8, window_bounds = array<i64: 1, 4, 8, 8>}, {transform_indices = @transform_9, window_bounds = array<i64: 1, 4, 8, 8>}]} {
    %c0 = arith.constant 0 : index
    %c0_0 = arith.constant 0 : index
    %c0_1 = arith.constant 0 : index
    %0 = vector.load %arg2[%c0, %c0_0, %c0_1] : memref<1x8x32xf32, #tpu.memory_space<vmem>>, vector<1x8x32xf32>
    %1 = vector.shape_cast %0 : vector<1x8x32xf32> to vector<8x32xf32>
    %2 = arith.truncf %1 : vector<8x32xf32> to vector<8x32xbf16>
    %c0_2 = arith.constant 0 : index
    %c0_3 = arith.constant 0 : index
    %3 = vector.load %arg3[%c0_2, %c0_3] : memref<32x32xbf16, #tpu.memory_space<vmem>>, vector<32x32xbf16>
    %cst = arith.constant dense<0.000000e+00> : vector<8x32xf32>
    %4 = tpu.matmul %2, %3, %cst {dimension_numbers = #tpu.dot_dimension_numbers<[1], [0], [0], [1], [0, 0, 1, 1], [], []>} : vector<8x32xbf16>, vector<32x32xbf16>, vector<8x32xf32> -> vector<8x32xf32>
    %c0_4 = arith.constant 0 : index
    %c0_5 = arith.constant 0 : index
    %5 = vector.load %arg4[%c0_4, %c0_5] : memref<1x32xf32, #tpu.memory_space<vmem>>, vector<1x32xf32>
    %6 = vector.shape_cast %5 : vector<1x32xf32> to vector<32xf32>
    %7 = vector.shape_cast %6 : vector<32xf32> to vector<1x32xf32>
    %8 = vector.broadcast %7 : vector<1x32xf32> to vector<8x32xf32>
    %9 = arith.addf %4, %8 : vector<8x32xf32>
    %10 = vector.shape_cast %9 : vector<8x32xf32> to vector<8x4x8xf32>
    %11 = tpu.transpose %10, [1, 0, 2] : vector<8x4x8xf32> -> vector<4x8x8xf32>
    %12 = arith.truncf %11 : vector<4x8x8xf32> to vector<4x8x8xbf16>
    %c0_6 = arith.constant 0 : index
    %c0_7 = arith.constant 0 : index
    %c0_8 = arith.constant 0 : index
    %c0_9 = arith.constant 0 : index
    %13 = vector.load %arg9[%c0_6, %c0_7, %c0_8, %c0_9] : memref<1x4x8x8xbf16, #tpu.memory_space<vmem>>, vector<1x4x8x8xbf16>
    %14 = vector.shape_cast %13 : vector<1x4x8x8xbf16> to vector<4x8x8xbf16>
    %15 = vector.shape_cast %12 : vector<4x8x8xbf16> to vector<1x4x8x8xbf16>
    tpu.vector_store %arg9[%c0_6, %c0_7, %c0_8, %c0_9], %15 {strides = array<i32>} : memref<1x4x8x8xbf16, #tpu.memory_space<vmem>>, vector<1x4x8x8xbf16>,
    %c0_10 = arith.constant 0 : index
    %c0_11 = arith.constant 0 : index
    %16 = vector.load %arg5[%c0_10, %c0_11] : memref<32x32xbf16, #tpu.memory_space<vmem>>, vector<32x32xbf16>
    %cst_12 = arith.constant dense<0.000000e+00> : vector<8x32xf32>
    %17 = tpu.matmul %2, %16, %cst_12 {dimension_numbers = #tpu.dot_dimension_numbers<[1], [0], [0], [1], [0, 0, 1, 1], [], []>} : vector<8x32xbf16>, vector<32x32xbf16>, vector<8x32xf32> -> vector<8x32xf32>
    %c0_13 = arith.constant 0 : index
    %c0_14 = arith.constant 0 : index
    %18 = vector.load %arg6[%c0_13, %c0_14] : memref<1x32xf32, #tpu.memory_space<vmem>>, vector<1x32xf32>
    %19 = vector.shape_cast %18 : vector<1x32xf32> to vector<32xf32>
    %20 = vector.shape_cast %19 : vector<32xf32> to vector<1x32xf32>
    %21 = vector.broadcast %20 : vector<1x32xf32> to vector<8x32xf32>
    %22 = arith.addf %17, %21 : vector<8x32xf32>
    %23 = vector.shape_cast %22 : vector<8x32xf32> to vector<8x4x8xf32>
    %24 = tpu.transpose %23, [1, 0, 2] : vector<8x4x8xf32> -> vector<4x8x8xf32>
    %25 = arith.truncf %24 : vector<4x8x8xf32> to vector<4x8x8xbf16>
    %c0_15 = arith.constant 0 : index
    %c0_16 = arith.constant 0 : index
    %c0_17 = arith.constant 0 : index
    %c0_18 = arith.constant 0 : index
    %26 = vector.load %arg10[%c0_15, %c0_16, %c0_17, %c0_18] : memref<1x4x8x8xbf16, #tpu.memory_space<vmem>>, vector<1x4x8x8xbf16>
    %27 = vector.shape_cast %26 : vector<1x4x8x8xbf16> to vector<4x8x8xbf16>
    %28 = vector.shape_cast %25 : vector<4x8x8xbf16> to vector<1x4x8x8xbf16>
    tpu.vector_store %arg10[%c0_15, %c0_16, %c0_17, %c0_18], %28 {strides = array<i32>} : memref<1x4x8x8xbf16, #tpu.memory_space<vmem>>, vector<1x4x8x8xbf16>,
    %c0_19 = arith.constant 0 : index
    %c0_20 = arith.constant 0 : index
    %29 = vector.load %arg7[%c0_19, %c0_20] : memref<32x32xbf16, #tpu.memory_space<vmem>>, vector<32x32xbf16>
    %cst_21 = arith.constant dense<0.000000e+00> : vector<8x32xf32>
    %30 = tpu.matmul %2, %29, %cst_21 {dimension_numbers = #tpu.dot_dimension_numbers<[1], [0], [0], [1], [0, 0, 1, 1], [], []>} : vector<8x32xbf16>, vector<32x32xbf16>, vector<8x32xf32> -> vector<8x32xf32>
    %c0_22 = arith.constant 0 : index
    %c0_23 = arith.constant 0 : index
    %31 = vector.load %arg8[%c0_22, %c0_23] : memref<1x32xf32, #tpu.memory_space<vmem>>, vector<1x32xf32>
    %32 = vector.shape_cast %31 : vector<1x32xf32> to vector<32xf32>
    %33 = vector.shape_cast %32 : vector<32xf32> to vector<1x32xf32>
    %34 = vector.broadcast %33 : vector<1x32xf32> to vector<8x32xf32>
    %35 = arith.addf %30, %34 : vector<8x32xf32>
    %36 = vector.shape_cast %35 : vector<8x32xf32> to vector<8x4x8xf32>
    %37 = tpu.transpose %36, [1, 0, 2] : vector<8x4x8xf32> -> vector<4x8x8xf32>
    %38 = arith.truncf %37 : vector<4x8x8xf32> to vector<4x8x8xbf16>
    %c0_24 = arith.constant 0 : index
    %c0_25 = arith.constant 0 : index
    %c0_26 = arith.constant 0 : index
    %c0_27 = arith.constant 0 : index
    %39 = vector.load %arg11[%c0_24, %c0_25, %c0_26, %c0_27] : memref<1x4x8x8xbf16, #tpu.memory_space<vmem>>, vector<1x4x8x8xbf16>
    %40 = vector.shape_cast %39 : vector<1x4x8x8xbf16> to vector<4x8x8xbf16>
    %41 = vector.shape_cast %38 : vector<4x8x8xbf16> to vector<1x4x8x8xbf16>
    tpu.vector_store %arg11[%c0_24, %c0_25, %c0_26, %c0_27], %41 {strides = array<i32>} : memref<1x4x8x8xbf16, #tpu.memory_space<vmem>>, vector<1x4x8x8xbf16>,
    return
  }
  func.func @transform_0(%arg0: i32, %arg1: i32) -> (i32, i32, i32) {
    %c0_i32 = arith.constant 0 : i32
    %c0_i32_0 = arith.constant 0 : i32
    return %arg0, %arg1, %c0_i32 : i32, i32, i32
  }
  func.func @transform_1(%arg0: i32, %arg1: i32) -> (i32, i32) {
    %c0_i32 = arith.constant 0 : i32
    %c0_i32_0 = arith.constant 0 : i32
    %c0_i32_1 = arith.constant 0 : i32
    return %c0_i32, %c0_i32_0 : i32, i32
  }
  func.func @transform_2(%arg0: i32, %arg1: i32) -> (i32, i32) {
    %c0_i32 = arith.constant 0 : i32
    %c0_i32_0 = arith.constant 0 : i32
    %c0_i32_1 = arith.constant 0 : i32
    return %c0_i32, %c0_i32_0 : i32, i32
  }
  func.func @transform_3(%arg0: i32, %arg1: i32) -> (i32, i32) {
    %c0_i32 = arith.constant 0 : i32
    %c0_i32_0 = arith.constant 0 : i32
    %c0_i32_1 = arith.constant 0 : i32
    return %c0_i32, %c0_i32_0 : i32, i32
  }
  func.func @transform_4(%arg0: i32, %arg1: i32) -> (i32, i32) {
    %c0_i32 = arith.constant 0 : i32
    %c0_i32_0 = arith.constant 0 : i32
    %c0_i32_1 = arith.constant 0 : i32
    return %c0_i32, %c0_i32_0 : i32, i32
  }
  func.func @transform_5(%arg0: i32, %arg1: i32) -> (i32, i32) {
    %c0_i32 = arith.constant 0 : i32
    %c0_i32_0 = arith.constant 0 : i32
    %c0_i32_1 = arith.constant 0 : i32
    return %c0_i32, %c0_i32_0 : i32, i32
  }
  func.func @transform_6(%arg0: i32, %arg1: i32) -> (i32, i32) {
    %c0_i32 = arith.constant 0 : i32
    %c0_i32_0 = arith.constant 0 : i32
    %c0_i32_1 = arith.constant 0 : i32
    return %c0_i32, %c0_i32_0 : i32, i32
  }
  func.func @transform_7(%arg0: i32, %arg1: i32) -> (i32, i32, i32, i32) {
    %c0_i32 = arith.constant 0 : i32
    %c0_i32_0 = arith.constant 0 : i32
    %c0_i32_1 = arith.constant 0 : i32
    return %arg0, %c0_i32, %arg1, %c0_i32_0 : i32, i32, i32, i32
  }
  func.func @transform_8(%arg0: i32, %arg1: i32) -> (i32, i32, i32, i32) {
    %c0_i32 = arith.constant 0 : i32
    %c0_i32_0 = arith.constant 0 : i32
    %c0_i32_1 = arith.constant 0 : i32
    return %arg0, %c0_i32, %arg1, %c0_i32_0 : i32, i32, i32, i32
  }
  func.func @transform_9(%arg0: i32, %arg1: i32) -> (i32, i32, i32, i32) {
    %c0_i32 = arith.constant 0 : i32
    %c0_i32_0 = arith.constant 0 : i32
    %c0_i32_1 = arith.constant 0 : i32
    return %arg0, %c0_i32, %arg1, %c0_i32_0 : i32, i32, i32, i32
  }
}

module attributes {stable_mosaic.version = 11 : i64} {
  func.func @qkv_proj_kernel(%arg0: i32, %arg1: i32, %arg2: memref<1x8x32xf32, #tpu.memory_space<vmem>>, %arg3: memref<32x32xbf16, #tpu.memory_space<vmem>>, %arg4: memref<1x32xf32, #tpu.memory_space<vmem>>, %arg5: memref<32x32xbf16, #tpu.memory_space<vmem>>, %arg6: memref<1x32xf32, #tpu.memory_space<vmem>>, %arg7: memref<32x32xbf16, #tpu.memory_space<vmem>>, %arg8: memref<1x32xf32, #tpu.memory_space<vmem>>, %arg9: memref<1x4x8x8xbf16, #tpu.memory_space<vmem>>, %arg10: memref<1x4x8x8xbf16, #tpu.memory_space<vmem>>, %arg11: memref<1x4x8x8xbf16, #tpu.memory_space<vmem>>) attributes {dimension_semantics = [#tpu.dimension_semantics<parallel>, #tpu.dimension_semantics<parallel>], iteration_bounds = array<i64: 2, 1>, scalar_prefetch = 0 : i64, scratch_operands = 0 : i64, tpu.core_type = #tpu.core_type<tc>, window_params = [{transform_indices = @transform_0, window_bounds = array<i64: 1, 8, 32>}, {pipeline_mode = #tpu.pipeline_mode<synchronous>, transform_indices = @transform_1, window_bounds = array<i64: 32, 32>}, {pipeline_mode = #tpu.pipeline_mode<synchronous>, transform_indices = @transform_2, window_bounds = array<i64: 1, 32>}, {pipeline_mode = #tpu.pipeline_mode<synchronous>, transform_indices = @transform_3, window_bounds = array<i64: 32, 32>}, {pipeline_mode = #tpu.pipeline_mode<synchronous>, transform_indices = @transform_4, window_bounds = array<i64: 1, 32>}, {pipeline_mode = #tpu.pipeline_mode<synchronous>, transform_indices = @transform_5, window_bounds = array<i64: 32, 32>}, {pipeline_mode = #tpu.pipeline_mode<synchronous>, transform_indices = @transform_6, window_bounds = array<i64: 1, 32>}, {transform_indices = @transform_7, window_bounds = array<i64: 1, 4, 8, 8>}, {transform_indices = @transform_8, window_bounds = array<i64: 1, 4, 8, 8>}, {transform_indices = @transform_9, window_bounds = array<i64: 1, 4, 8, 8>}]} {
    %c0 = arith.constant 0 : index
    %c0_0 = arith.constant 0 : index
    %c0_1 = arith.constant 0 : index
    %0 = vector.load %arg2[%c0, %c0_0, %c0_1] : memref<1x8x32xf32, #tpu.memory_space<vmem>>, vector<1x8x32xf32>
    %1 = vector.shape_cast %0 : vector<1x8x32xf32> to vector<8x32xf32>
    %2 = arith.truncf %1 : vector<8x32xf32> to vector<8x32xbf16>
    %c0_2 = arith.constant 0 : index
    %c0_3 = arith.constant 0 : index
    %3 = vector.load %arg3[%c0_2, %c0_3] : memref<32x32xbf16, #tpu.memory_space<vmem>>, vector<32x32xbf16>
    %cst = arith.constant dense<0.000000e+00> : vector<8x32xf32>
    %4 = tpu.matmul %2, %3, %cst {dimension_numbers = #tpu.dot_dimension_numbers<[1], [0], [0], [1], [0, 0, 1, 1], [], []>} : vector<8x32xbf16>, vector<32x32xbf16>, vector<8x32xf32> -> vector<8x32xf32>
    %c0_4 = arith.constant 0 : index
    %c0_5 = arith.constant 0 : index
    %5 = vector.load %arg4[%c0_4, %c0_5] : memref<1x32xf32, #tpu.memory_space<vmem>>, vector<1x32xf32>
    %6 = vector.shape_cast %5 : vector<1x32xf32> to vector<32xf32>
    %7 = vector.shape_cast %6 : vector<32xf32> to vector<1x32xf32>
    %8 = vector.broadcast %7 : vector<1x32xf32> to vector<8x32xf32>
    %9 = arith.addf %4, %8 : vector<8x32xf32>
    %10 = vector.shape_cast %9 : vector<8x32xf32> to vector<8x4x8xf32>
    %11 = tpu.transpose %10, [1, 0, 2] : vector<8x4x8xf32> -> vector<4x8x8xf32>
    %12 = arith.truncf %11 : vector<4x8x8xf32> to vector<4x8x8xbf16>
    %c0_6 = arith.constant 0 : index
    %c0_7 = arith.constant 0 : index
    %c0_8 = arith.constant 0 : index
    %c0_9 = arith.constant 0 : index
    %13 = vector.load %arg9[%c0_6, %c0_7, %c0_8, %c0_9] : memref<1x4x8x8xbf16, #tpu.memory_space<vmem>>, vector<1x4x8x8xbf16>
    %14 = vector.shape_cast %13 : vector<1x4x8x8xbf16> to vector<4x8x8xbf16>
    %15 = vector.shape_cast %12 : vector<4x8x8xbf16> to vector<1x4x8x8xbf16>
    tpu.vector_store %arg9[%c0_6, %c0_7, %c0_8, %c0_9], %15 {strides = array<i32>} : memref<1x4x8x8xbf16, #tpu.memory_space<vmem>>, vector<1x4x8x8xbf16>,
    %c0_10 = arith.constant 0 : index
    %c0_11 = arith.constant 0 : index
    %16 = vector.load %arg5[%c0_10, %c0_11] : memref<32x32xbf16, #tpu.memory_space<vmem>>, vector<32x32xbf16>
    %cst_12 = arith.constant dense<0.000000e+00> : vector<8x32xf32>
    %17 = tpu.matmul %2, %16, %cst_12 {dimension_numbers = #tpu.dot_dimension_numbers<[1], [0], [0], [1], [0, 0, 1, 1], [], []>} : vector<8x32xbf16>, vector<32x32xbf16>, vector<8x32xf32> -> vector<8x32xf32>
    %c0_13 = arith.constant 0 : index
    %c0_14 = arith.constant 0 : index
    %18 = vector.load %arg6[%c0_13, %c0_14] : memref<1x32xf32, #tpu.memory_space<vmem>>, vector<1x32xf32>
    %19 = vector.shape_cast %18 : vector<1x32xf32> to vector<32xf32>
    %20 = vector.shape_cast %19 : vector<32xf32> to vector<1x32xf32>
    %21 = vector.broadcast %20 : vector<1x32xf32> to vector<8x32xf32>
    %22 = arith.addf %17, %21 : vector<8x32xf32>
    %23 = vector.shape_cast %22 : vector<8x32xf32> to vector<8x4x8xf32>
    %24 = tpu.transpose %23, [1, 0, 2] : vector<8x4x8xf32> -> vector<4x8x8xf32>
    %25 = arith.truncf %24 : vector<4x8x8xf32> to vector<4x8x8xbf16>
    %c0_15 = arith.constant 0 : index
    %c0_16 = arith.constant 0 : index
    %c0_17 = arith.constant 0 : index
    %c0_18 = arith.constant 0 : index
    %26 = vector.load %arg10[%c0_15, %c0_16, %c0_17, %c0_18] : memref<1x4x8x8xbf16, #tpu.memory_space<vmem>>, vector<1x4x8x8xbf16>
    %27 = vector.shape_cast %26 : vector<1x4x8x8xbf16> to vector<4x8x8xbf16>
    %28 = vector.shape_cast %25 : vector<4x8x8xbf16> to vector<1x4x8x8xbf16>
    tpu.vector_store %arg10[%c0_15, %c0_16, %c0_17, %c0_18], %28 {strides = array<i32>} : memref<1x4x8x8xbf16, #tpu.memory_space<vmem>>, vector<1x4x8x8xbf16>,
    %c0_19 = arith.constant 0 : index
    %c0_20 = arith.constant 0 : index
    %29 = vector.load %arg7[%c0_19, %c0_20] : memref<32x32xbf16, #tpu.memory_space<vmem>>, vector<32x32xbf16>
    %cst_21 = arith.constant dense<0.000000e+00> : vector<8x32xf32>
    %30 = tpu.matmul %2, %29, %cst_21 {dimension_numbers = #tpu.dot_dimension_numbers<[1], [0], [0], [1], [0, 0, 1, 1], [], []>} : vector<8x32xbf16>, vector<32x32xbf16>, vector<8x32xf32> -> vector<8x32xf32>
    %c0_22 = arith.constant 0 : index
    %c0_23 = arith.constant 0 : index
    %31 = vector.load %arg8[%c0_22, %c0_23] : memref<1x32xf32, #tpu.memory_space<vmem>>, vector<1x32xf32>
    %32 = vector.shape_cast %31 : vector<1x32xf32> to vector<32xf32>
    %33 = vector.shape_cast %32 : vector<32xf32> to vector<1x32xf32>
    %34 = vector.broadcast %33 : vector<1x32xf32> to vector<8x32xf32>
    %35 = arith.addf %30, %34 : vector<8x32xf32>
    %36 = vector.shape_cast %35 : vector<8x32xf32> to vector<8x4x8xf32>
    %37 = tpu.transpose %36, [1, 0, 2] : vector<8x4x8xf32> -> vector<4x8x8xf32>
    %38 = arith.truncf %37 : vector<4x8x8xf32> to vector<4x8x8xbf16>
    %c0_24 = arith.constant 0 : index
    %c0_25 = arith.constant 0 : index
    %c0_26 = arith.constant 0 : index
    %c0_27 = arith.constant 0 : index
    %39 = vector.load %arg11[%c0_24, %c0_25, %c0_26, %c0_27] : memref<1x4x8x8xbf16, #tpu.memory_space<vmem>>, vector<1x4x8x8xbf16>
    %40 = vector.shape_cast %39 : vector<1x4x8x8xbf16> to vector<4x8x8xbf16>
    %41 = vector.shape_cast %38 : vector<4x8x8xbf16> to vector<1x4x8x8xbf16>
    tpu.vector_store %arg11[%c0_24, %c0_25, %c0_26, %c0_27], %41 {strides = array<i32>} : memref<1x4x8x8xbf16, #tpu.memory_space<vmem>>, vector<1x4x8x8xbf16>,
    return
  }
  func.func @transform_0(%arg0: i32, %arg1: i32) -> (i32, i32, i32) {
    %c0_i32 = arith.constant 0 : i32
    %c0_i32_0 = arith.constant 0 : i32
    return %arg0, %arg1, %c0_i32 : i32, i32, i32
  }
  func.func @transform_1(%arg0: i32, %arg1: i32) -> (i32, i32) {
    %c0_i32 = arith.constant 0 : i32
    %c0_i32_0 = arith.constant 0 : i32
    %c0_i32_1 = arith.constant 0 : i32
    return %c0_i32, %c0_i32_0 : i32, i32
  }
  func.func @transform_2(%arg0: i32, %arg1: i32) -> (i32, i32) {
    %c0_i32 = arith.constant 0 : i32
    %c0_i32_0 = arith.constant 0 : i32
    %c0_i32_1 = arith.constant 0 : i32
    return %c0_i32, %c0_i32_0 : i32, i32
  }
  func.func @transform_3(%arg0: i32, %arg1: i32) -> (i32, i32) {
    %c0_i32 = arith.constant 0 : i32
    %c0_i32_0 = arith.constant 0 : i32
    %c0_i32_1 = arith.constant 0 : i32
    return %c0_i32, %c0_i32_0 : i32, i32
  }
  func.func @transform_4(%arg0: i32, %arg1: i32) -> (i32, i32) {
    %c0_i32 = arith.constant 0 : i32
    %c0_i32_0 = arith.constant 0 : i32
    %c0_i32_1 = arith.constant 0 : i32
    return %c0_i32, %c0_i32_0 : i32, i32
  }
  func.func @transform_5(%arg0: i32, %arg1: i32) -> (i32, i32) {
    %c0_i32 = arith.constant 0 : i32
    %c0_i32_0 = arith.constant 0 : i32
    %c0_i32_1 = arith.constant 0 : i32
    return %c0_i32, %c0_i32_0 : i32, i32
  }
  func.func @transform_6(%arg0: i32, %arg1: i32) -> (i32, i32) {
    %c0_i32 = arith.constant 0 : i32
    %c0_i32_0 = arith.constant 0 : i32
    %c0_i32_1 = arith.constant 0 : i32
    return %c0_i32, %c0_i32_0 : i32, i32
  }
  func.func @transform_7(%arg0: i32, %arg1: i32) -> (i32, i32, i32, i32) {
    %c0_i32 = arith.constant 0 : i32
    %c0_i32_0 = arith.constant 0 : i32
    %c0_i32_1 = arith.constant 0 : i32
    return %arg0, %c0_i32, %arg1, %c0_i32_0 : i32, i32, i32, i32
  }
  func.func @transform_8(%arg0: i32, %arg1: i32) -> (i32, i32, i32, i32) {
    %c0_i32 = arith.constant 0 : i32
    %c0_i32_0 = arith.constant 0 : i32
    %c0_i32_1 = arith.constant 0 : i32
    return %arg0, %c0_i32, %arg1, %c0_i32_0 : i32, i32, i32, i32
  }
  func.func @transform_9(%arg0: i32, %arg1: i32) -> (i32, i32, i32, i32) {
    %c0_i32 = arith.constant 0 : i32
    %c0_i32_0 = arith.constant 0 : i32
    %c0_i32_1 = arith.constant 0 : i32
    return %arg0, %c0_i32, %arg1, %c0_i32_0 : i32, i32, i32, i32
  }
}

</mosaic_0001>

<bundles_post_ra>
// kernel: tpu_custom_call.1
= control target key start
LH: loop header
LB: loop body
LE: loop exit
PB: predicated region body
PF: predicated region fallthrough
CT: control target
= control target key end

     0   :  { %s2571_s0 = inlined_call_operand.hbm [shape: f32[2,8,32], index: 0, kind: input, shape index: {}]   ;;  %s2572_s1 = inlined_call_operand.hbm [shape: bf16[32,32], index: 1, kind: input, shape index: {}]   ;;  %s2573_s2 = inlined_call_operand.hbm [shape: f32[1,32], index: 2, kind: input, shape index: {}]   ;;  %s2574_s3 = inlined_call_operand.hbm [shape: bf16[32,32], index: 3, kind: input, shape index: {}]   ;;  %s2575_s4 = inlined_call_operand.hbm [shape: f32[1,32], index: 4, kind: input, shape index: {}]   ;;  %s2576_s5 = inlined_call_operand.hbm [shape: bf16[32,32], index: 5, kind: input, shape index: {}]   ;;  %s2577_s6 = inlined_call_operand.hbm [shape: f32[1,32], index: 6, kind: input, shape index: {}]   ;;  %s2578_s7 = inlined_call_operand.hbm [shape: bf16[2,4,8,8], index: 7, kind: output, shape index: {0}]   ;;  %s2579_s8 = inlined_call_operand.hbm [shape: bf16[2,4,8,8], index: 8, kind: output, shape index: {1}]   ;;  %s2580_s9 = inlined_call_operand.hbm [shape: bf16[2,4,8,8], index: 9, kind: output, shape index: {2}]  }
   0x1   :  { %2592 = sst [smem:[#allocation24_spill]] %s2571_s0 }
   0x2   :  { %2593 = sst [smem:[#allocation25_spill]] %s2572_s1 }
   0x3   :  { %2594 = sst [smem:[#allocation26_spill]] %s2578_s7 }
   0x4   :  { %2595 = sst [smem:[#allocation27_spill]] %s2579_s8 }
   0x5   :  { %2596 = sst [smem:[#allocation28_spill]] %s2580_s9 }
   0x6   :  { %15 = vsyncpa [#allocation3], 0 }
   0x7   :  { %17 = vsyncpa [#allocation3 + $0x1], 0 }
   0x8   :  { %18 = vsyncpa [#allocation6], 0 }
   0x9   :  { %19 = vsyncpa [#allocation9], 0 }
   0xa   :  { %20 = vsyncpa [#allocation12], 0 }
   0xb   :  { %21 = vsyncpa [#allocation4], 0 }
   0xc   :  { %23 = vsyncpa [#allocation4 + $0x1], 0 }
   0xd   :  { %24 = vsyncpa [#allocation16], 0 }
   0xe   :  { %26 = vsyncpa [#allocation16 + $0x1], 0  ;;  %s2055_s30 = smov 0   ;;  %s2057_s10 = smov 0  }
   0xf   :  { %s2059_s11 = smov 0   ;;  %s2061_s12 = smov 0  }
  0x10   :  { %s2063_s13 = smov 0   ;;  %s2065_s14 = smov 0  }
  0x11 LB: > { %s2086_s15 = sadd.s32 4294967295, %s1982_s14   ;;  %p1394_p0 = scmp.ge.s32.totalorder %s1982_s14, 1  ;;  %s1982_s14 = sphi %s2065_s14, %s32_s14   ;;  %s1978_s13 = sphi %s2063_s13, %s2630_s13   ;;  %s1974_s12 = sphi %s2061_s12, %s2629_s12   ;;  %s1970_s11 = sphi %s2059_s11, %s2628_s11   ;;  %s1966_s10 = sphi %s2057_s10, %s2627_s10   ;;  %s1962_s30 = sphi %s2055_s30, %s2626_s30  }
  0x12   : > { %p2584_p1 = scmp.eq.s32.totalorder %s2086_s15, 0  ;;  %p287_p2 = scmp.lt.s32.totalorder %s1982_s14, 3 }
  0x13   : > { %s1984_s17 = smov [#allocation5]   ;;  %s1985_s20 = smov [#allocation8]  }
  0x14   : > { %p2091_p3 = pnand %p1394_p0, %p287_p2  ;;  %s299_s18 = sshll.u32 %s1984_s17, 4  ;;  %s2095_s18 = int_to_ptr.vmem [resolvable:$true] %s299_s18 }
  0x15   : > { %s323_s21 = sshll.u32 %s1985_s20, 4  ;;  %s1986_s22 = smov [#allocation11]   ;;  %s2106_s21 = int_to_ptr.vmem [resolvable:$true] %s323_s21 }
  0x16   : > { %s2597_s16 = scalar_select %p2091_p3, 1, 0 }
  0x17   : > { %p1512_p4 = pneg %p2091_p3  ;;  %s2108_s23 = sshll.u32 %s1986_s22, 4  ;;  %s348_s23 = int_to_ptr.vmem [resolvable:$true] %s2108_s23 }
  0x18   : > { %s2599_s1 = sld [smem:[#allocation25_spill]] }
  0x19   : > { %p2102_p6 = pnand %p1512_p4, %p2584_p1 }
  0x1b   : > { %p2118_p8 = pneg %p2102_p6 }
  0x1e   : > { %s1630_s26 = scalar_lea.hbm %s2599_s1, 256 }
  0x1f   : > { %p1631_p7 = scmp.ne.s32.totalorder %s2599_s1, %s1630_s26  ;;  %p1637_p11 = scmp.lt.u32.totalorder %s1630_s26, %s2599_s1 }
  0x21   : > { %p1633_p9 = pnand %p2118_p8, %p1631_p7 }
  0x23   : > { %p1634_p10 = pneg %p1633_p9 }
  0x25   : > { %p1639_p12 = pnand %p1637_p11, %p1634_p10 }
  0x27   : > { %1642 = shalt.err (!%p1639_p12)
}
  0x28   : > { %s1643_s22 = scalar_lea.vmem %s2095_s18, 256  ;;  %p1651_p4 = scmp.lt.s32.totalorder %s2095_s18, %s2095_s18 }
  0x29   : > { %p1644_p13 = scmp.ne.s32.totalorder %s2095_s18, %s1643_s22  ;;  %p1652_p5 = scmp.lt.s32.totalorder %s1643_s22, %s1643_s22 }
  0x2b   : > { %p1646_p0 = pnand %p1644_p13, %p2118_p8  ;;  %p1653_p7 = por %p1652_p5, %p1651_p4 }
  0x2d   : > { %p1647_p2 = pneg %p1646_p0 }
  0x2f   : > { %p1654_p9 = pnand %p1653_p7, %p1647_p2 }
  0x31   : > { %1657 = shalt.err (!%p1654_p9)
}
  0x32   : > { %s1987_s24 = smov 64   ;;  %s1988_s25 = smov 4  }
  0x33   : > { %1515 = dma.hbm_to_vmem [thread:$0]  (!%p2102_p6), %s2599_s1, 256, %s2095_s18, [#allocation6], %s1987_s24, %s1987_s24, %s1988_s25  }
  0x34   : > { %s1658_s20 = scalar_lea.hbm %s2574_s3, 256 }
  0x35   : > { %p1659_p5 = scmp.ne.s32.totalorder %s2574_s3, %s1658_s20  ;;  %p1665_p12 = scmp.lt.u32.totalorder %s1658_s20, %s2574_s3 }
  0x37   : > { %p1661_p10 = pnand %p1659_p5, %p2118_p8 }
  0x39   : > { %p1662_p11 = pneg %p1661_p10 }
  0x3b   : > { %p1667_p13 = pnand %p1665_p12, %p1662_p11 }
  0x3d   : > { %1670 = shalt.err (!%p1667_p13)
}
  0x3e   : > { %s1671_s18 = scalar_lea.vmem %s2106_s21, 256  ;;  %p1679_p7 = scmp.lt.s32.totalorder %s2106_s21, %s2106_s21 }
  0x3f   : > { %p1672_p0 = scmp.ne.s32.totalorder %s2106_s21, %s1671_s18  ;;  %p1680_p9 = scmp.lt.s32.totalorder %s1671_s18, %s1671_s18 }
  0x41   : > { %p1674_p2 = pnand %p1672_p0, %p2118_p8  ;;  %p1681_p5 = por %p1680_p9, %p1679_p7 }
  0x43   : > { %p1675_p4 = pneg %p1674_p2 }
  0x45   : > { %p1682_p10 = pnand %p1681_p5, %p1675_p4 }
  0x47   : > { %1685 = shalt.err (!%p1682_p10)
}
  0x48   : > { %1521 = dma.hbm_to_vmem [thread:$0]  (!%p2102_p6), %s2574_s3, 256, %s2106_s21, [#allocation9], %s1987_s24, %s1987_s24, %s1988_s25  }
  0x49   : > { %s1686_s27 = scalar_lea.hbm %s2576_s5, 256 }
  0x4a   : > { %p1687_p11 = scmp.ne.s32.totalorder %s2576_s5, %s1686_s27  ;;  %p1693_p0 = scmp.lt.u32.totalorder %s1686_s27, %s2576_s5 }
  0x4c   : > { %p1689_p12 = pnand %p1687_p11, %p2118_p8 }
  0x4e   : > { %p1690_p13 = pneg %p1689_p12 }
  0x50   : > { %p1695_p2 = pnand %p1693_p0, %p1690_p13 }
  0x52   : > { %1698 = shalt.err (!%p1695_p2)
}
  0x53   : > { %s1699_s18 = scalar_lea.vmem %s348_s23, 256  ;;  %p1707_p5 = scmp.lt.s32.totalorder %s348_s23, %s348_s23 }
  0x54   : > { %p1700_p4 = scmp.ne.s32.totalorder %s348_s23, %s1699_s18  ;;  %p1708_p10 = scmp.lt.s32.totalorder %s1699_s18, %s1699_s18 }
  0x56   : > { %p1702_p7 = pnand %p1700_p4, %p2118_p8  ;;  %p1709_p1 = por %p1708_p10, %p1707_p5 }
  0x58   : > { %p1703_p9 = pneg %p1702_p7 }
  0x5a   : > { %p1710_p3 = pnand %p1709_p1, %p1703_p9 }
  0x5c   : > { %1713 = shalt.err (!%p1710_p3)
}
  0x5d   : > { %1527 = dma.hbm_to_vmem [thread:$0]  (!%p2102_p6), %s2576_s5, 256, %s348_s23, [#allocation12], %s1987_s24, %s1987_s24, %s1988_s25  }
  0x5e   : > { %s1989_s8 = smov [#allocation7]   ;;  %s1990_s26 = smov [#allocation10]  }
  0x5f   : > { %s313_s9 = sshll.u32 %s1989_s8, 4  ;;  %s337_s27 = sshll.u32 %s1990_s26, 4  ;;  %s314_s9 = int_to_ptr.vmem [resolvable:$true] %s313_s9  ;;  %s338_s27 = int_to_ptr.vmem [resolvable:$true] %s337_s27 }
  0x60   : > { %s1714_s20 = scalar_lea.hbm %s2573_s2, 16 }
  0x61   : > { %p1715_p1 = scmp.ne.s32.totalorder %s2573_s2, %s1714_s20  ;;  %p1721_p12 = scmp.lt.u32.totalorder %s1714_s20, %s2573_s2 }
  0x63   : > { %p1717_p3 = pnand %p1715_p1, %p2118_p8 }
  0x65   : > { %p1718_p11 = pneg %p1717_p3 }
  0x67   : > { %p1723_p13 = pnand %p1721_p12, %p1718_p11 }
  0x69   : > { %1726 = shalt.err (!%p1723_p13)
}
  0x6a   : > { %s1727_s23 = scalar_lea.vmem %s314_s9, 16  ;;  %s1734_s24 = scalar_lea.vmem %s314_s9, 32 }
  0x6b   : > { %p1728_p0 = scmp.ne.s32.totalorder %s314_s9, %s1727_s23  ;;  %p1735_p7 = scmp.lt.s32.totalorder %s314_s9, %s314_s9 }
  0x6c   : > { %p1736_p9 = scmp.lt.s32.totalorder %s1734_s24, %s1727_s23 }
  0x6d   : > { %p1730_p2 = pnand %p1728_p0, %p2118_p8 }
  0x6e   : > { %p1737_p5 = por %p1736_p9, %p1735_p7 }
  0x6f   : > { %p1731_p4 = pneg %p1730_p2 }
  0x71   : > { %p1738_p10 = pnand %p1737_p5, %p1731_p4 }
  0x73   : > { %1741 = shalt.err (!%p1738_p10)
}
  0x74   : > { %1518 = dma.hbm_to_vmem [thread:$0]  (!%p2102_p6), %s2573_s2, 16, %s314_s9, [#allocation6]  }
  0x75   : > { %s1742_s26 = scalar_lea.hbm %s2575_s4, 16 }
  0x76   : > { %p1743_p1 = scmp.ne.s32.totalorder %s2575_s4, %s1742_s26  ;;  %p1749_p12 = scmp.lt.u32.totalorder %s1742_s26, %s2575_s4 }
  0x78   : > { %p1745_p3 = pnand %p1743_p1, %p2118_p8 }
  0x7a   : > { %p1746_p11 = pneg %p1745_p3 }
  0x7c   : > { %p1751_p13 = pnand %p1749_p12, %p1746_p11 }
  0x7e   : > { %1754 = shalt.err (!%p1751_p13)
}
  0x7f   : > { %s1755_s18 = scalar_lea.vmem %s338_s27, 16  ;;  %s1762_s9 = scalar_lea.vmem %s338_s27, 32 }
  0x80   : > { %p1756_p0 = scmp.ne.s32.totalorder %s338_s27, %s1755_s18  ;;  %p1763_p7 = scmp.lt.s32.totalorder %s338_s27, %s338_s27 }
  0x81   : > { %p1764_p9 = scmp.lt.s32.totalorder %s1762_s9, %s1755_s18 }
  0x82   : > { %p1758_p2 = pnand %p1756_p0, %p2118_p8 }
  0x83   : > { %p1765_p5 = por %p1764_p9, %p1763_p7 }
  0x84   : > { %p1759_p4 = pneg %p1758_p2 }
  0x86   : > { %p1766_p10 = pnand %p1765_p5, %p1759_p4 }
  0x88   : > { %1769 = shalt.err (!%p1766_p10)
}
  0x89   : > { %1524 = dma.hbm_to_vmem [thread:$0]  (!%p2102_p6), %s2575_s4, 16, %s338_s27, [#allocation9]  }
  0x8a   : > { %s1991_s24 = smov [#allocation13]   ;;  %s1770_s8 = scalar_lea.hbm %s2577_s6, 16 }
  0x8b   : > { %s361_s25 = sshll.u32 %s1991_s24, 4  ;;  %p1771_p1 = scmp.ne.s32.totalorder %s2577_s6, %s1770_s8  ;;  %s362_s25 = int_to_ptr.vmem [resolvable:$true] %s361_s25 }
  0x8c   : > { %p1777_p12 = scmp.lt.u32.totalorder %s1770_s8, %s2577_s6 }
  0x8d   : > { %p1773_p3 = pnand %p1771_p1, %p2118_p8 }
  0x8f   : > { %p1774_p11 = pneg %p1773_p3 }
  0x91   : > { %p1779_p13 = pnand %p1777_p12, %p1774_p11 }
  0x93   : > { %1782 = shalt.err (!%p1779_p13)
}
  0x94   : > { %s1783_s27 = scalar_lea.vmem %s362_s25, 16  ;;  %s1790_s22 = scalar_lea.vmem %s362_s25, 32 }
  0x95   : > { %p1784_p0 = scmp.ne.s32.totalorder %s362_s25, %s1783_s27  ;;  %p1791_p7 = scmp.lt.s32.totalorder %s362_s25, %s362_s25 }
  0x96   : > { %p1792_p9 = scmp.lt.s32.totalorder %s1790_s22, %s1783_s27 }
  0x97   : > { %p1786_p2 = pnand %p1784_p0, %p2118_p8 }
  0x98   : > { %p1793_p5 = por %p1792_p9, %p1791_p7 }
  0x99   : > { %p1787_p4 = pneg %p1786_p2 }
  0x9b   : > { %p1794_p10 = pnand %p1793_p5, %p1787_p4 }
  0x9d   : > { %1797 = shalt.err (!%p1794_p10)
}
  0x9e   : > { %1530 = dma.hbm_to_vmem [thread:$0]  (!%p2102_p6), %s2577_s6, 16, %s362_s25, [#allocation12]  }
  0x9f   : > { %s2586_s29 = sadd.s32 4294967294, %s1982_s14   ;;  %s44_s21 = sadd.s32 1, %s1978_s13 }
  0xa0   : > { %p46_p8 = scmp.ge.s32.totalorder %s44_s21, 2  ;;  %s53_s19 = sadd.s32 1, %s1970_s11 }
  0xa1   : > { %p60_p1 = scmp.ne.s32.totalorder %s1970_s11, %s1966_s10  ;;  %p61_p3 = scmp.eq.s32.totalorder %s1982_s14, 0 }
  0xa2   : > { %s2632_s21 = smov (%p46_p8, %s44_s21), 0  ;;  %p66_p12 = scmp.ne.s32.totalorder %s1966_s10, %s1962_s30 }
  0xa3   : > { %p2252_p11 = por %p61_p3, %p60_p1  ;;  %s48_s24 = ssub.s32 %s1978_s13, %s2632_s21 }
  0xa4   : > { %p218_p6 = scmp.eq.s32.totalorder %s2086_s15, 1  ;;  %p51_p13 = scmp.eq.s32.totalorder %s48_s24, 0 }
  0xa5   : > { %p2602_p0 = scmp.eq.s32.totalorder %s2086_s15, 0  ;;  %p224_p7 = scmp.eq.s32.totalorder %s2586_s29, 1 }
  0xa6   : > { %p2267_p4 = por %p218_p6, %p60_p1  ;;  %p1551_p5 = scmp.lt.s32.totalorder %s1982_s14, 2 }
  0xa7   : > { %p2263_p2 = por %p2602_p0, %p66_p12  ;;  %p2276_p9 = por %p224_p7, %p66_p12 }
  0xa8   : > { %s2604_s7 = scalar_select %p2267_p4, 1, 0 }
  0xa9   : > { %s2274_s1 = scalar_select %p51_p13, %s1970_s11, %s53_s19  }
  0xaa   : > { %s2605_s8 = scalar_select %p2276_p9, 1, 0 }
  0xab   : > { %s372_s26 = sand.u32 1, %s1970_s11   ;;  %s1403_s28 = sshll.u32 %s1978_s13, 7 }
  0xac   : > { %s1402_s17 = sshll.u32 %s372_s26, 3  ;;  %s2606_s0 = sld [smem:[#allocation24_spill]] }
  0xad   : > { %s376_s18 = scalar_lea.vmem [#allocation2], %s1402_s17  ;;  %p2290_p10 = pnand %p1551_p5, %p2252_p11 }
  0xae   : > { %s384_s9 = sshll.u32 %s376_s18, 4  ;;  %s373_s24 = scalar_lea.sflag [#allocation3], %s372_s26  ;;  %s2294_s9 = int_to_ptr.vmem [resolvable:$true] %s384_s9 }
  0xaf   : > { %p1800_p1 = pneg %p2290_p10 }
  0xb2   : > { %s2286_s22 = scalar_lea.hbm %s2606_s0, %s1403_s28  ;;  %s1803_s23 = scalar_lea.hbm %s2606_s0, 256 }
  0xb3   : > { %s1798_s29 = scalar_lea.hbm %s2286_s22, 128  ;;  %p1804_p11 = scmp.lt.u32.totalorder %s2286_s22, %s2606_s0 }
  0xb4   : > { %p1799_p8 = scmp.ne.s32.totalorder %s2286_s22, %s1798_s29  ;;  %p1805_p6 = scmp.lt.u32.totalorder %s1803_s23, %s1798_s29 }
  0xb5   : > { %p1807_p0 = scmp.lt.u32.totalorder %s1798_s29, %s2286_s22 }
  0xb6   : > { %p1801_p3 = pnand %p1800_p1, %p1799_p8  ;;  %p1806_p13 = por %p1805_p6, %p1804_p11 }
  0xb8   : > { %p1802_p12 = pneg %p1801_p3  ;;  %p1808_p7 = por %p1807_p0, %p1806_p13 }
  0xba   : > { %p1809_p5 = pnand %p1808_p7, %p1802_p12 }
  0xbc   : > { %1812 = shalt.err (!%p1809_p5)
}
  0xbd   : > { %s1813_s26 = scalar_lea.vmem %s2294_s9, 128  ;;  %s1992_s18 = smov [#allocation2]  }
  0xbe   : > { %p1814_p8 = scmp.ne.s32.totalorder %s2294_s9, %s1813_s26  ;;  %s1818_s28 = sshll.u32 %s1992_s18, 4  ;;  %s1819_s28 = int_to_ptr.vmem [resolvable:$false] %s1818_s28 }
  0xbf   : > { %s1820_s17 = scalar_lea.vmem %s1819_s28, 256  ;;  %p1821_p4 = scmp.lt.s32.totalorder %s2294_s9, %s1819_s28 }
  0xc0   : > { %p1816_p3 = pnand %p1814_p8, %p1800_p1  ;;  %p1822_p11 = scmp.lt.s32.totalorder %s1820_s17, %s1813_s26 }
  0xc2   : > { %p1817_p9 = pneg %p1816_p3  ;;  %p1823_p6 = por %p1822_p11, %p1821_p4 }
  0xc4   : > { %p1824_p13 = pnand %p1823_p6, %p1817_p9 }
  0xc6   : > { %1827 = shalt.err (!%p1824_p13)
}
  0xc7   : > { %1534 = dma.hbm_to_vmem [thread:$0]  (!%p2290_p10), %s2286_s22, 128, %s2294_s9, %s373_s24  }
  0xc8   : > { %p2608_p12 = scmp.ne.s32.totalorder %s2597_s16, 0 }
  0xc9   : > { %s2324_s29 = sand.u32 (!%p2608_p12), 1, %s1966_s10  }
  0xca   : > { %393 = sbr.rel (%p2608_p12) target bundleno = 660 (0x294), region = 48  ;;  %s1405_s23 = sshll.u32 (!%p2608_p12), %s2324_s29, 3 }
  0xcb   : > { %s396_s20 = scalar_lea.sflag (!%p2608_p12), [#allocation3], %s2324_s29  ;;  %s399_s27 = scalar_lea.vmem (!%p2608_p12), [#allocation2], %s1405_s23 }
  0xd1   : > { %1937 = dma.done.wait (%p2263_p2), %s396_s20, 128  }
  0xd2   : > { %1939 = vsyncadd (%p2263_p2), %s396_s20, 4294967168  ;;  %p2609_p4 = scmp.eq.s32.totalorder %s2086_s15, 0 }
  0xd4   : > { %1941 = dma.done.wait (%p2609_p4), [#allocation6], 272   ;;  %p2610_p9 = pmov %p2609_p4 }
  0xd5   : > { %p2611_p10 = pmov %p2609_p4 }
  0xd6   : > { %1943 = vsyncadd (%p2610_p9), [#allocation6], 4294967024 }
  0xd7   : > { %1945 = dma.done.wait (%p2611_p10), [#allocation9], 272   ;;  %p2612_p1 = pmov %p2609_p4 }
  0xd9   : > { %1947 = vsyncadd (%p2612_p1), [#allocation9], 4294967024  ;;  %p2613_p0 = pmov %p2612_p1 }
  0xdb   : > { %1949 = dma.done.wait (%p2613_p0), [#allocation12], 272   ;;  %p2614_p7 = pmov %p2613_p0 }
  0xdc   : > { %v1993_v0 = vmov 0.0   ;;  %vm1994_vm0 = vmmov 0   ;;  %v1624_v1 = vld [vmem:[#allocation8] sm:$0xff]   ;;  %v1625_v2 = vld [vmem:[#allocation5] sm:$0xff]   ;;  %v1627_v4 = vld [vmem:[#allocation5 + $0x8] sm:$0xff]   ;;  %vm494_vm1 = vcmask 261120   ;;  %v553_v29 = vlaneseq }
  0xdd   : > { %1951 = vsyncadd (%p2614_p7), [#allocation12], 4294967024  ;;  %1464 = vmatprep.subr.bf16.mxu1 %v1993_v0  ;;  %1456 = vmatprep.subr.bf16.mxu0 %v1993_v0  ;;  %v1626_v3 = vld [vmem:[#allocation8 + $0x8] sm:$0xff]   ;;  %v1628_v7 = vld [vmem:[#allocation11] sm:$0xff]   ;;  %s1995_s16 = smov 104   ;;  %s1996_s25 = smov 120  }
  0xde   : > { %1468 = vmatprep.mubr.msk.bf16.mxu1 %vm1994_vm0, %v1993_v0  ;;  %1460 = vmatprep.mubr.msk.bf16.mxu0 %vm1994_vm0, %v1993_v0  ;;  %v469_v5 = vld [vmem:[%s399_s27] sm:$0xff]  ;;  %v1421_v9 = vld [vmem:[#allocation10] ss:$0 sm:$0xff]  ;;  %s1997_s22 = smov 112   ;;  %v1998_v27 = vmov 1983009808  }
  0xdf   : > { %1465 = vmatpush3.bf16.msra.mxu1 %v1624_v1  ;;  %1457 = vmatpush3.bf16.msra.mxu0 %v1625_v2  ;;  %v470_v6 = vpack.c.bf16 %v469_v5, %v469_v5  ;;  %v1629_v8 = vld [vmem:[#allocation11 + $0x8] sm:$0xff]   ;;  %v1427_v21 = vld [vmem:[#allocation13] ss:$0 sm:$0xff]  ;;  %v551_v28 = vunpack.c.l.s4 %v1998_v27  ;;  %v1999_v30 = vmov 1934713408   ;;  %v554_v33 = vshrl.u32 %v553_v29, 7 }
  0xe0   : > { %1466 = vmatprep.subr.bf16.mxu1 %v1993_v0  ;;  %1458 = vmatprep.subr.bf16.mxu0 %v1993_v0  ;;  %v1415_v11 = vld [vmem:[#allocation7] ss:$0 sm:$0xff]  ;;  %v583_v31 = vunpack.c.l.s4 %v1999_v30  ;;  %vm688_vm2 = vcmask 60416   ;;  %s2379_s9 = sshll.u32 %s2324_s29, 4  ;;  %s1132_s19 = sand.u32 1, %s2086_s15  }
  0xe1   : > { %v552_v32 = vunpack.c.0.s8 %v551_v28  ;;  %s2391_s24 = sshll.u32 %s1974_s12, 8  ;;  %s460_s26 = scalar_lea.vmem [#allocation15], %s2379_s9 }
  0xe2   : > { %v584_v36 = vunpack.c.0.s8 %v583_v31  ;;  %s1169_s18 = sshll.u32 %s460_s26, 4  ;;  %s2615_s17 = sld [smem:[#allocation27_spill]]  ;;  %s2400_s18 = int_to_ptr.vmem [resolvable:$true] %s1169_s18 }
  0xe3   : > { %1467 = vmatpush3.bf16.msra.mxu1 %v1626_v3  ;;  %1459 = vmatpush3.bf16.msra.mxu0 %v1627_v4  ;;  %v2352_v37 = vsub.s32 %v552_v32, %v554_v33  ;;  %s2415_s20 = scalar_lea.vmem [#allocation14], %s2379_s9  ;;  %p2616_p5 = scmp.ne.s32.totalorder %s2604_s7, 0 }
  0xe4   : > { %1472 = vmatprep.subr.bf16.mxu0 %v1993_v0  ;;  %v2354_v44 = vsub.s32 %v584_v36, %v554_v33 }
  0xe6   : > { %1469 = vmatmul.mubr.msk.bf16.vlgmr.msra.gmra.mrb[0].mxu1 %vm494_vm1, %v470_v6  ;;  %1461 = vmatmul.mubr.msk.bf16.vlgmr.msra.gmra.mrb[0].mxu0 %vm494_vm1, %v470_v6 }
  0xe7   : > { %1473 = vmatpush3.bf16.msra.mxu0 %v1628_v7  ;;  %1476 = vmatprep.mubr.msk.bf16.mxu0 %vm1994_vm0, %v1993_v0 }
  0xe8   : > { %1474 = vmatprep.subr.bf16.mxu0 %v1993_v0  ;;  %s2398_s23 = scalar_lea.hbm %s2615_s17, %s2391_s24 }
  0xeb   : > { %1475 = vmatpush3.bf16.msra.mxu0 %v1629_v8 }
  0xee   : > { %1477 = vmatmul.mubr.msk.bf16.vlgmr.msra.gmra.mrb[4].mxu0 %vm494_vm1, %v470_v6 }
 0x1b9   : > { %v750_v10 = vpop.f32.mrb[0].mxu1  ;;  %v532_v13 = vpop.f32.mrb[0].mxu0 }
 0x1ba   : > { %v751_v12 = vadd.f32 %v1421_v9, %v750_v10  ;;  %v1470_v14 = vpop.f32.mrb[1].mxu1  ;;  %v1462_v15 = vpop.f32.mrb[1].mxu0  ;;  %v533_v17 = vadd.f32 %v1415_v11, %v532_v13 }
 0x1bb   : > { %v753_v16 = vpop.f32.mrb[2].mxu1  ;;  %v535_v18 = vpop.f32.mrb[2].mxu0 }
 0x1bc   : > { %763 = vrot.lane.b32.xlu1 %v751_v12, %s1995_s16  ;;  %757 = vrot.lane.b32.xlu0 %v751_v12, %s1996_s25  ;;  %v1471_v19 = vpop.f32.mrb[3].mxu1  ;;  %v1463_v20 = vpop.f32.mrb[3].mxu0 }
 0x1c0   : > { %760 = vrot.lane.b32.xlu0 %v751_v12, %s1997_s22  ;;  %539 = vrot.lane.b32.xlu1 %v533_v17, %s1996_s25 }
 0x1c1   : > { %v967_v22 = vpop.f32.mrb[4].mxu0 }
 0x1c2   : > { %v1478_v23 = vpop.f32.mrb[5].mxu0  ;;  %v2347_v24 = vadd.f32 %v1427_v21, %v967_v22 }
 0x1c3   : > { %v970_v25 = vpop.f32.mrb[6].mxu0 }
 0x1c4   : > { %542 = vrot.lane.b32.xlu0 %v533_v17, %s1997_s22  ;;  %545 = vrot.lane.b32.xlu1 %v533_v17, %s1995_s16  ;;  %v1479_v26 = vpop.f32.mrb[7].mxu0 }
 0x1c8   : > { %977 = vrot.lane.b32.xlu1 %v2347_v24, %s1997_s22  ;;  %974 = vrot.lane.b32.xlu0 %v2347_v24, %s1996_s25  ;;  %s1828_s25 = scalar_lea.vmem %s2400_s18, 256  ;;  %s2000_s22 = smov [#allocation15]  }
 0x1c9   : > { %p1829_p2 = scmp.ne.s32.totalorder %s2400_s18, %s1828_s25  ;;  %s1832_s12 = sshll.u32 %s2000_s22, 4  ;;  %s1833_s12 = int_to_ptr.vmem [resolvable:$false] %s1832_s12 }
 0x1ca   : > { %p1835_p11 = scmp.lt.s32.totalorder %s2400_s18, %s1833_s12 }
 0x1cb   : > { %p1830_p8 = pnand %p1829_p2, %p2616_p5 }
 0x1cc   : > { %980 = vrot.lane.b32.xlu0 %v2347_v24, %s1995_s16  ;;  %s2420_s16 = scalar_lea.sflag [#allocation16], %s1132_s19 }
 0x1cd   : > { %p1831_p3 = pneg %p1830_p8 }
 0x22e   : > { %v764_v34 = vpop.permute.xlu1 %763  ;;  %v758_v35 = vpop.permute.xlu0 %757 }
 0x22f   : > { %v782_v38 = vcombine.low %v758_v35, %v764_v34  ;;  %v783_v39 = vcombine.high %v758_v35, %v764_v34 }
 0x231   : > { %v790_v45 = vrot.slane %v782_v38, %v2352_v37  ;;  %v797_v46 = vrot.slane %v783_v39, %v2352_v37 }
 0x232   : > { %v761_v40 = vpop.permute.xlu0 %760  ;;  %v540_v41 = vpop.permute.xlu1 %539 }
 0x233   : > { %v766_v42 = vcombine.low %v751_v12, %v761_v40  ;;  %v767_v43 = vcombine.high %v751_v12, %v761_v40 }
 0x235   : > { %v774_v47 = vrot.slane %v766_v42, %v2352_v37  ;;  %v781_v48 = vrot.slane %v767_v43, %v2352_v37 }
 0x236   : > { %v543_v49 = vpop.permute.xlu0 %542  ;;  %v546_v50 = vpop.permute.xlu1 %545 }
 0x237   : > { %v798_v51 = vcombine.low %v774_v47, %v790_v45  ;;  %v799_v52 = vcombine.high %v774_v47, %v790_v45  ;;  %v814_v53 = vcombine.low %v781_v48, %v797_v46  ;;  %v815_v54 = vcombine.high %v781_v48, %v797_v46 }
 0x238   : > { %v548_v55 = vcombine.low %v533_v17, %v543_v49  ;;  %v549_v56 = vcombine.high %v533_v17, %v543_v49  ;;  %v564_v57 = vcombine.low %v540_v41, %v546_v50  ;;  %v565_v58 = vcombine.high %v540_v41, %v546_v50 }
 0x239   : > { %v806_v59 = vrot.slane %v798_v51, %v2354_v44  ;;  %v813_v60 = vrot.slane %v799_v52, %v2354_v44  ;;  %v822_v61 = vrot.slane %v814_v53, %v2354_v44  ;;  %v829_v62 = vrot.slane %v815_v54, %v2354_v44 }
 0x23a   : > { %v556_v63 = vrot.slane %v548_v55, %v2352_v37  ;;  %v563_v0 = vrot.slane %v549_v56, %v2352_v37  ;;  %v572_v1 = vrot.slane %v564_v57, %v2352_v37  ;;  %v579_v2 = vrot.slane %v565_v58, %v2352_v37  ;;  %v2376_v19 = vpop.permute.xlu0 %974  ;;  %v978_v47 = vpop.permute.xlu1 %977 }
 0x23b   : > { %v834_v3 = vcombine.low %v806_v59, %v813_v60  ;;  %v1425_v4 = vcombine.high %v806_v59, %v813_v60  ;;  %v850_v5 = vcombine.low %v822_v61, %v829_v62  ;;  %v1426_v6 = vcombine.high %v822_v61, %v829_v62 }
 0x23c   : > { %v580_v7 = vcombine.low %v556_v63, %v572_v1  ;;  %v581_v8 = vcombine.high %v556_v63, %v572_v1  ;;  %v596_v9 = vcombine.low %v563_v0, %v579_v2  ;;  %v597_v10 = vcombine.high %v563_v0, %v579_v2 }
 0x23d   : > { %v841_v11 = vrot.slane %v834_v3, %v2352_v37  ;;  %v849_v12 = vrot.slane %v1425_v4, %v2352_v37  ;;  %v857_v13 = vrot.slane %v850_v5, %v2352_v37  ;;  %v865_v14 = vrot.slane %v1426_v6, %v2352_v37 }
 0x23e   : > { %v588_v15 = vrot.slane %v580_v7, %v2354_v44  ;;  %v595_v16 = vrot.slane %v581_v8, %v2354_v44  ;;  %v604_v17 = vrot.slane %v596_v9, %v2354_v44  ;;  %v611_v18 = vrot.slane %v597_v10, %v2354_v44  ;;  %v981_v48 = vpop.permute.xlu0 %980 }
 0x23f   : > { %v866_v20 = vcombine.low %v841_v11, %v849_v12  ;;  %v867_v21 = vcombine.high %v841_v11, %v849_v12  ;;  %v882_v22 = vcombine.low %v857_v13, %v865_v14  ;;  %v883_v23 = vcombine.high %v857_v13, %v865_v14 }
 0x240   : > { %v616_v25 = vcombine.low %v588_v15, %v595_v16  ;;  %v1419_v26 = vcombine.high %v588_v15, %v595_v16  ;;  %v632_v27 = vcombine.low %v604_v17, %v611_v18  ;;  %v1420_v28 = vcombine.high %v604_v17, %v611_v18 }
 0x241   : > { %v874_v29 = vrot.slane %v866_v20, %v2354_v44  ;;  %v881_v30 = vrot.slane %v867_v21, %v2354_v44  ;;  %v890_v31 = vrot.slane %v882_v22, %v2354_v44  ;;  %v897_v32 = vrot.slane %v883_v23, %v2354_v44 }
 0x242   : > { %v623_v33 = vrot.slane %v616_v25, %v2352_v37  ;;  %v631_v34 = vrot.slane %v1419_v26, %v2352_v37  ;;  %v639_v35 = vrot.slane %v632_v27, %v2352_v37  ;;  %v647_v36 = vrot.slane %v1420_v28, %v2352_v37 }
 0x243   : > { %v898_v38 = vcombine.low %v874_v29, %v890_v31  ;;  %v899_v39 = vcombine.high %v874_v29, %v890_v31  ;;  %v900_v40 = vcombine.low %v881_v30, %v897_v32  ;;  %v901_v41 = vcombine.high %v881_v30, %v897_v32 }
 0x244   : > { %v648_v42 = vcombine.low %v623_v33, %v631_v34  ;;  %v649_v43 = vcombine.high %v623_v33, %v631_v34  ;;  %v664_v45 = vcombine.low %v639_v35, %v647_v36  ;;  %v665_v46 = vcombine.high %v639_v35, %v647_v36 }
 0x245   : > { %v902_v49 = vpack.c.bf16 %v898_v38, %v898_v38  ;;  %v903_v50 = vpack.c.bf16 %v899_v39, %v899_v39  ;;  %v904_v51 = vpack.c.bf16 %v900_v40, %v900_v40  ;;  %v905_v52 = vpack.c.bf16 %v901_v41, %v901_v41 }
 0x246   : > { %v656_v53 = vrot.slane %v648_v42, %v2354_v44  ;;  %v663_v54 = vrot.slane %v649_v43, %v2354_v44  ;;  %v672_v55 = vrot.slane %v664_v45, %v2354_v44  ;;  %v679_v56 = vrot.slane %v665_v46, %v2354_v44 }
 0x247   : > { %v983_v57 = vcombine.low %v2347_v24, %v978_v47  ;;  %v984_v58 = vcombine.high %v2347_v24, %v978_v47  ;;  %v999_v59 = vcombine.low %v2376_v19, %v981_v48  ;;  %v1000_v60 = vcombine.high %v2376_v19, %v981_v48  ;;  %906 = vst.msk [vmem:[%s460_s26] sm:$0xf] %vm688_vm2, %v902_v49 }
 0x248   : > { %907 = vst.msk [vmem:[%s460_s26 + $0x4] sm:$0xf] %vm688_vm2, %v903_v50  ;;  %908 = vst.msk [vmem:[%s460_s26 + $0x8] sm:$0xf] %vm688_vm2, %v904_v51  ;;  %v680_v61 = vcombine.low %v656_v53, %v672_v55  ;;  %v681_v24 = vcombine.high %v656_v53, %v672_v55  ;;  %v682_v62 = vcombine.low %v663_v54, %v679_v56 }
 0x249   : > { %909 = vst.msk [vmem:[%s460_s26 + $0xc] sm:$0xf] %vm688_vm2, %v905_v52  ;;  %v683_v63 = vcombine.high %v663_v54, %v679_v56  ;;  %s1834_s26 = scalar_lea.vmem %s1833_s12, 512 }
 0x24a   : > { %p1836_p6 = scmp.lt.s32.totalorder %s1834_s26, %s1828_s25 }
 0x24c   : > { %p1837_p13 = por %p1836_p6, %p1835_p11 }
 0x24e   : > { %p1838_p12 = pnand %p1837_p13, %p1831_p3 }
 0x250   : > { %1841 = shalt.err (!%p1838_p12)
}
 0x251   : > { %s1842_s15 = scalar_lea.hbm %s2398_s23, 256  ;;  %s1846_s22 = scalar_lea.hbm %s2615_s17, 512 }
 0x252   : > { %p1843_p4 = scmp.ne.s32.totalorder %s2398_s23, %s1842_s15  ;;  %p1847_p1 = scmp.lt.u32.totalorder %s2398_s23, %s2615_s17 }
 0x253   : > { %p1848_p0 = scmp.lt.u32.totalorder %s1846_s22, %s1842_s15  ;;  %p1850_p2 = scmp.lt.u32.totalorder %s1842_s15, %s2398_s23 }
 0x254   : > { %p1844_p9 = pnand %p1843_p4, %p2616_p5 }
 0x255   : > { %p1849_p7 = por %p1848_p0, %p1847_p1 }
 0x256   : > { %p1845_p10 = pneg %p1844_p9 }
 0x257   : > { %p1851_p8 = por %p1850_p2, %p1849_p7 }
 0x259   : > { %p1852_p3 = pnand %p1851_p8, %p1845_p10 }
 0x25b   : > { %1855 = shalt.err (!%p1852_p3)
}
 0x25c   : > { %s2588_s25 = smov 64   ;;  %s2590_s26 = smov 4   ;;  %v991_v0 = vrot.slane %v983_v57, %v2352_v37  ;;  %v998_v1 = vrot.slane %v984_v58, %v2352_v37  ;;  %v1007_v2 = vrot.slane %v999_v59, %v2352_v37  ;;  %v1014_v3 = vrot.slane %v1000_v60, %v2352_v37 }
 0x25d   : > { %1507 = dma.vmem_to_hbm [thread:$0]  (%p2616_p5), %s2400_s18, 256, %s2398_s23, %s2420_s16, %s2588_s25, %s2588_s25, %s2590_s26   ;;  %v684_v4 = vpack.c.bf16 %v680_v61, %v680_v61  ;;  %v685_v5 = vpack.c.bf16 %v681_v24, %v681_v24  ;;  %v686_v6 = vpack.c.bf16 %v682_v62, %v682_v62  ;;  %v687_v7 = vpack.c.bf16 %v683_v63, %v683_v63 }
 0x25e   : > { %s2617_s19 = sld [smem:[#allocation26_spill]]  ;;  %s2618_s23 = sshll.u32 %s2415_s20, 4  ;;  %v1015_v8 = vcombine.low %v991_v0, %v1007_v2  ;;  %v1016_v9 = vcombine.high %v991_v0, %v1007_v2  ;;  %v1031_v10 = vcombine.low %v998_v1, %v1014_v3  ;;  %v1032_v11 = vcombine.high %v998_v1, %v1014_v3  ;;  %s2459_s23 = int_to_ptr.vmem [resolvable:$true] %s2618_s23 }
 0x25f   : > { %689 = vst.msk [vmem:[%s2415_s20] sm:$0xf] %vm688_vm2, %v684_v4  ;;  %690 = vst.msk [vmem:[%s2415_s20 + $0x4] sm:$0xf] %vm688_vm2, %v685_v5  ;;  %s1856_s22 = scalar_lea.vmem %s2459_s23, 256  ;;  %s2003_s12 = smov [#allocation14]  }
 0x260   : > { %691 = vst.msk [vmem:[%s2415_s20 + $0x8] sm:$0xf] %vm688_vm2, %v686_v6  ;;  %692 = vst.msk [vmem:[%s2415_s20 + $0xc] sm:$0xf] %vm688_vm2, %v687_v7  ;;  %v1023_v12 = vrot.slane %v1015_v8, %v2354_v44  ;;  %v1030_v13 = vrot.slane %v1016_v9, %v2354_v44  ;;  %v1039_v14 = vrot.slane %v1031_v10, %v2354_v44  ;;  %p1857_p11 = scmp.ne.s32.totalorder %s2459_s23, %s1856_s22  ;;  %s1860_s27 = sshll.u32 %s2003_s12, 4  ;;  %s1861_s27 = int_to_ptr.vmem [resolvable:$false] %s1860_s27 }
 0x261   : > { %v1046_v15 = vrot.slane %v1032_v11, %v2354_v44  ;;  %s1862_s15 = scalar_lea.vmem %s1861_s27, 512  ;;  %p1863_p12 = scmp.lt.s32.totalorder %s2459_s23, %s1861_s27 }
 0x262   : > { %p1858_p6 = pnand %p1857_p11, %p2616_p5  ;;  %p1864_p4 = scmp.lt.s32.totalorder %s1862_s15, %s1856_s22 }
 0x264   : > { %s2455_s18 = scalar_lea.hbm %s2617_s19, %s2391_s24  ;;  %p1859_p13 = pneg %p1858_p6 }
 0x265   : > { %p1865_p9 = por %p1864_p4, %p1863_p12 }
 0x267   : > { %p1866_p10 = pnand %p1865_p9, %p1859_p13 }
 0x269   : > { %1869 = shalt.err (!%p1866_p10)
}
 0x26a   : > { %s1870_s20 = scalar_lea.hbm %s2455_s18, 256  ;;  %s1874_s12 = scalar_lea.hbm %s2617_s19, 512 }
 0x26b   : > { %p1871_p1 = scmp.ne.s32.totalorder %s2455_s18, %s1870_s20  ;;  %p1875_p2 = scmp.lt.u32.totalorder %s2455_s18, %s2617_s19 }
 0x26c   : > { %p1876_p8 = scmp.lt.u32.totalorder %s1874_s12, %s1870_s20  ;;  %p1878_p11 = scmp.lt.u32.totalorder %s1870_s20, %s2455_s18 }
 0x26d   : > { %p1872_p0 = pnand %p1871_p1, %p2616_p5 }
 0x26e   : > { %p1877_p3 = por %p1876_p8, %p1875_p2 }
 0x26f   : > { %p1873_p7 = pneg %p1872_p0 }
 0x270   : > { %p1879_p6 = por %p1878_p11, %p1877_p3 }
 0x272   : > { %p1880_p13 = pnand %p1879_p6, %p1873_p7 }
 0x274   : > { %1883 = shalt.err (!%p1880_p13)
}
 0x275   : > { %s2619_s22 = smov 4   ;;  %s2620_s15 = smov 64   ;;  %v1051_v16 = vcombine.low %v1023_v12, %v1030_v13  ;;  %v1431_v17 = vcombine.high %v1023_v12, %v1030_v13  ;;  %v1067_v18 = vcombine.low %v1039_v14, %v1046_v15  ;;  %v1432_v19 = vcombine.high %v1039_v14, %v1046_v15 }
 0x276   : > { %s2621_s0 = scalar_lea.sflag [#allocation4], %s2324_s29 }
 0x277   : > { %1506 = dma.vmem_to_hbm [thread:$0]  (%p2616_p5), %s2459_s23, 256, %s2455_s18, %s2621_s0, %s2620_s15, %s2620_s15, %s2619_s22   ;;  %v1058_v20 = vrot.slane %v1051_v16, %v2352_v37  ;;  %v1066_v21 = vrot.slane %v1431_v17, %v2352_v37  ;;  %v1074_v22 = vrot.slane %v1067_v18, %v2352_v37  ;;  %v1082_v23 = vrot.slane %v1432_v19, %v2352_v37 }
 0x278   : > { %s467_s0 = scalar_lea.vmem [#allocation17], %s2379_s9  ;;  %s2622_s18 = sld [smem:[#allocation28_spill]] }
 0x279   : > { %v1083_v25 = vcombine.low %v1058_v20, %v1066_v21  ;;  %v1084_v26 = vcombine.high %v1058_v20, %v1066_v21  ;;  %v1099_v27 = vcombine.low %v1074_v22, %v1082_v23  ;;  %v1100_v28 = vcombine.high %v1074_v22, %v1082_v23  ;;  %s1186_s29 = sshll.u32 %s467_s0, 4  ;;  %s2515_s29 = int_to_ptr.vmem [resolvable:$true] %s1186_s29 }
 0x27a   : > { %s1884_s9 = scalar_lea.vmem %s2515_s29, 256 }
 0x27b   : > { %v1091_v29 = vrot.slane %v1083_v25, %v2354_v44  ;;  %v1098_v30 = vrot.slane %v1084_v26, %v2354_v44  ;;  %v1107_v31 = vrot.slane %v1099_v27, %v2354_v44  ;;  %v1114_v32 = vrot.slane %v1100_v28, %v2354_v44  ;;  %p1885_p12 = scmp.ne.s32.totalorder %s2515_s29, %s1884_s9 }
 0x27d   : > { %v1115_v33 = vcombine.low %v1091_v29, %v1107_v31  ;;  %v1116_v34 = vcombine.high %v1091_v29, %v1107_v31  ;;  %v1117_v35 = vcombine.low %v1098_v30, %v1114_v32  ;;  %v1118_v37 = vcombine.high %v1098_v30, %v1114_v32  ;;  %p1886_p4 = pnand %p1885_p12, %p2616_p5 }
 0x27e   : > { %s2513_s23 = scalar_lea.hbm %s2622_s18, %s2391_s24  ;;  %s2004_s24 = smov [#allocation17]  }
 0x27f   : > { %v1119_v36 = vpack.c.bf16 %v1115_v33, %v1115_v33  ;;  %v1120_v38 = vpack.c.bf16 %v1116_v34, %v1116_v34  ;;  %v1121_v39 = vpack.c.bf16 %v1117_v35, %v1117_v35  ;;  %v1122_v40 = vpack.c.bf16 %v1118_v37, %v1118_v37  ;;  %p1887_p9 = pneg %p1886_p4  ;;  %s1888_s28 = sshll.u32 %s2004_s24, 4  ;;  %s1889_s28 = int_to_ptr.vmem [resolvable:$false] %s1888_s28 }
 0x280   : > { %s1890_s20 = scalar_lea.vmem %s1889_s28, 512  ;;  %p1891_p10 = scmp.lt.s32.totalorder %s2515_s29, %s1889_s28 }
 0x281   : > { %1123 = vst.msk [vmem:[%s467_s0] sm:$0xf] %vm688_vm2, %v1119_v36  ;;  %1124 = vst.msk [vmem:[%s467_s0 + $0x4] sm:$0xf] %vm688_vm2, %v1120_v38  ;;  %p1892_p1 = scmp.lt.s32.totalorder %s1890_s20, %s1884_s9 }
 0x282   : > { %1125 = vst.msk [vmem:[%s467_s0 + $0x8] sm:$0xf] %vm688_vm2, %v1121_v39  ;;  %1126 = vst.msk [vmem:[%s467_s0 + $0xc] sm:$0xf] %vm688_vm2, %v1122_v40 }
 0x283   : > { %p1893_p0 = por %p1892_p1, %p1891_p10 }
 0x285   : > { %p1894_p7 = pnand %p1893_p0, %p1887_p9 }
 0x287   : > { %1897 = shalt.err (!%p1894_p7)
}
 0x288   : > { %s1898_s12 = scalar_lea.hbm %s2513_s23, 256  ;;  %s1902_s25 = scalar_lea.hbm %s2622_s18, 512 }
 0x289   : > { %p1899_p2 = scmp.ne.s32.totalorder %s2513_s23, %s1898_s12  ;;  %p1903_p11 = scmp.lt.u32.totalorder %s2513_s23, %s2622_s18 }
 0x28a   : > { %p1904_p6 = scmp.lt.u32.totalorder %s1902_s25, %s1898_s12  ;;  %p1906_p12 = scmp.lt.u32.totalorder %s1898_s12, %s2513_s23 }
 0x28b   : > { %p1900_p8 = pnand %p1899_p2, %p2616_p5 }
 0x28c   : > { %p1905_p13 = por %p1904_p6, %p1903_p11 }
 0x28d   : > { %p1901_p3 = pneg %p1900_p8 }
 0x28e   : > { %p1907_p4 = por %p1906_p12, %p1905_p13 }
 0x290   : > { %p1908_p9 = pnand %p1907_p4, %p1901_p3 }
 0x292   : > { %1911 = shalt.err (!%p1908_p9)
}
 0x293   : > { %1508 = dma.vmem_to_hbm [thread:$0]  (%p2616_p5), %s2515_s29, 256, %s2513_s23, %s2420_s16, %s2620_s15, %s2620_s15, %s2619_s22  }
 0x294 PF: > { %s1201_s9 = sand.u32 1, %s1962_s30   ;;  %p2623_p10 = scmp.ne.s32.totalorder %s2605_s8, 0 }
 0x295   : > { %p2624_p1 = scmp.ge.s32.totalorder %s1982_s14, 2  ;;  %s1202_s28 = scalar_lea.sflag [#allocation4], %s1201_s9 }
 0x297   : > { %p1536_p0 = pnand %p2624_p1, %p2623_p10 }
 0x299   : > { %1953 = dma.done.wait (!%p1536_p0), %s1202_s28, 256  }
 0x29a   : > { %1955 = vsyncadd (!%p1536_p0), %s1202_s28, 4294967040  ;;  %s2625_s7 = sadd.s32 4294967294, %s1982_s14  }
 0x29b   : > { %s1210_s20 = sand.u32 1, %s2625_s7  }
 0x29c   : > { %s1211_s12 = scalar_lea.sflag [#allocation16], %s1210_s20 }
 0x29d   : > { %1957 = dma.done.wait (!%p1536_p0), %s1211_s12, 512  }
 0x29e   : > { %1959 = vsyncadd (!%p1536_p0), %s1211_s12, 4294966784  ;;  %s32_s14 = sadd.s32 1, %s1982_s14   ;;  %s2626_s30 = smov %s1966_s10 }
 0x29f   : > { %p29_p5 = scmp.ge.s32.totalorder %s32_s14, 4   ;;  %s2627_s10 = smov %s1970_s11 }
 0x2a0   : > { %s2628_s11 = smov %s2274_s1  ;;  %s2629_s12 = smov %s1978_s13 }
 0x2a1   : > { %s2630_s13 = smov %s2632_s21  ;;  %31 = sbr.rel (!%p29_p5) target bundleno = 17 (0x11), region = 149 }
 0x2a8   :  { %1225 = vsyncpa [#allocation3], 1 }
 0x2a9   :  { %1227 = vsyncpa [#allocation3 + $0x1], 1 }
 0x2aa   :  { %1228 = vsyncpa [#allocation6], 1 }
 0x2ab   :  { %1229 = vsyncpa [#allocation9], 1 }
 0x2ac   :  { %1230 = vsyncpa [#allocation12], 1 }
 0x2ad   :  { %1231 = vsyncpa [#allocation4], 1 }
 0x2ae   :  { %1233 = vsyncpa [#allocation4 + $0x1], 1 }
 0x2af   :  { %1234 = vsyncpa [#allocation16], 1 }
 0x2b0   :  { %1236 = vsyncpa [#allocation16 + $0x1], 1 }

// kernel: tpu_custom_call.1
= control target key start
LH: loop header
LB: loop body
LE: loop exit
PB: predicated region body
PF: predicated region fallthrough
CT: control target
= control target key end

     0   :  { %s2571_s0 = inlined_call_operand.hbm [shape: f32[2,8,32], index: 0, kind: input, shape index: {}]   ;;  %s2572_s1 = inlined_call_operand.hbm [shape: bf16[32,32], index: 1, kind: input, shape index: {}]   ;;  %s2573_s2 = inlined_call_operand.hbm [shape: f32[1,32], index: 2, kind: input, shape index: {}]   ;;  %s2574_s3 = inlined_call_operand.hbm [shape: bf16[32,32], index: 3, kind: input, shape index: {}]   ;;  %s2575_s4 = inlined_call_operand.hbm [shape: f32[1,32], index: 4, kind: input, shape index: {}]   ;;  %s2576_s5 = inlined_call_operand.hbm [shape: bf16[32,32], index: 5, kind: input, shape index: {}]   ;;  %s2577_s6 = inlined_call_operand.hbm [shape: f32[1,32], index: 6, kind: input, shape index: {}]   ;;  %s2578_s7 = inlined_call_operand.hbm [shape: bf16[2,4,8,8], index: 7, kind: output, shape index: {0}]   ;;  %s2579_s8 = inlined_call_operand.hbm [shape: bf16[2,4,8,8], index: 8, kind: output, shape index: {1}]   ;;  %s2580_s9 = inlined_call_operand.hbm [shape: bf16[2,4,8,8], index: 9, kind: output, shape index: {2}]  }
   0x1   :  { %2592 = sst [smem:[#allocation24_spill]] %s2571_s0 }
   0x2   :  { %2593 = sst [smem:[#allocation25_spill]] %s2572_s1 }
   0x3   :  { %2594 = sst [smem:[#allocation26_spill]] %s2578_s7 }
   0x4   :  { %2595 = sst [smem:[#allocation27_spill]] %s2579_s8 }
   0x5   :  { %2596 = sst [smem:[#allocation28_spill]] %s2580_s9 }
   0x6   :  { %15 = vsyncpa [#allocation3], 0 }
   0x7   :  { %17 = vsyncpa [#allocation3 + $0x1], 0 }
   0x8   :  { %18 = vsyncpa [#allocation6], 0 }
   0x9   :  { %19 = vsyncpa [#allocation9], 0 }
   0xa   :  { %20 = vsyncpa [#allocation12], 0 }
   0xb   :  { %21 = vsyncpa [#allocation4], 0 }
   0xc   :  { %23 = vsyncpa [#allocation4 + $0x1], 0 }
   0xd   :  { %24 = vsyncpa [#allocation16], 0 }
   0xe   :  { %26 = vsyncpa [#allocation16 + $0x1], 0  ;;  %s2055_s30 = smov 0   ;;  %s2057_s10 = smov 0  }
   0xf   :  { %s2059_s11 = smov 0   ;;  %s2061_s12 = smov 0  }
  0x10   :  { %s2063_s13 = smov 0   ;;  %s2065_s14 = smov 0  }
  0x11 LB: > { %s2086_s15 = sadd.s32 4294967295, %s1982_s14   ;;  %p1394_p0 = scmp.ge.s32.totalorder %s1982_s14, 1  ;;  %s1982_s14 = sphi %s2065_s14, %s32_s14   ;;  %s1978_s13 = sphi %s2063_s13, %s2630_s13   ;;  %s1974_s12 = sphi %s2061_s12, %s2629_s12   ;;  %s1970_s11 = sphi %s2059_s11, %s2628_s11   ;;  %s1966_s10 = sphi %s2057_s10, %s2627_s10   ;;  %s1962_s30 = sphi %s2055_s30, %s2626_s30  }
  0x12   : > { %p2584_p1 = scmp.eq.s32.totalorder %s2086_s15, 0  ;;  %p287_p2 = scmp.lt.s32.totalorder %s1982_s14, 3 }
  0x13   : > { %s1984_s17 = smov [#allocation5]   ;;  %s1985_s20 = smov [#allocation8]  }
  0x14   : > { %p2091_p3 = pnand %p1394_p0, %p287_p2  ;;  %s299_s18 = sshll.u32 %s1984_s17, 4  ;;  %s2095_s18 = int_to_ptr.vmem [resolvable:$true] %s299_s18 }
  0x15   : > { %s323_s21 = sshll.u32 %s1985_s20, 4  ;;  %s1986_s22 = smov [#allocation11]   ;;  %s2106_s21 = int_to_ptr.vmem [resolvable:$true] %s323_s21 }
  0x16   : > { %s2597_s16 = scalar_select %p2091_p3, 1, 0 }
  0x17   : > { %p1512_p4 = pneg %p2091_p3  ;;  %s2108_s23 = sshll.u32 %s1986_s22, 4  ;;  %s348_s23 = int_to_ptr.vmem [resolvable:$true] %s2108_s23 }
  0x18   : > { %s2599_s1 = sld [smem:[#allocation25_spill]] }
  0x19   : > { %p2102_p6 = pnand %p1512_p4, %p2584_p1 }
  0x1b   : > { %p2118_p8 = pneg %p2102_p6 }
  0x1e   : > { %s1630_s26 = scalar_lea.hbm %s2599_s1, 256 }
  0x1f   : > { %p1631_p7 = scmp.ne.s32.totalorder %s2599_s1, %s1630_s26  ;;  %p1637_p11 = scmp.lt.u32.totalorder %s1630_s26, %s2599_s1 }
  0x21   : > { %p1633_p9 = pnand %p2118_p8, %p1631_p7 }
  0x23   : > { %p1634_p10 = pneg %p1633_p9 }
  0x25   : > { %p1639_p12 = pnand %p1637_p11, %p1634_p10 }
  0x27   : > { %1642 = shalt.err (!%p1639_p12)
}
  0x28   : > { %s1643_s22 = scalar_lea.vmem %s2095_s18, 256  ;;  %p1651_p4 = scmp.lt.s32.totalorder %s2095_s18, %s2095_s18 }
  0x29   : > { %p1644_p13 = scmp.ne.s32.totalorder %s2095_s18, %s1643_s22  ;;  %p1652_p5 = scmp.lt.s32.totalorder %s1643_s22, %s1643_s22 }
  0x2b   : > { %p1646_p0 = pnand %p1644_p13, %p2118_p8  ;;  %p1653_p7 = por %p1652_p5, %p1651_p4 }
  0x2d   : > { %p1647_p2 = pneg %p1646_p0 }
  0x2f   : > { %p1654_p9 = pnand %p1653_p7, %p1647_p2 }
  0x31   : > { %1657 = shalt.err (!%p1654_p9)
}
  0x32   : > { %s1987_s24 = smov 64   ;;  %s1988_s25 = smov 4  }
  0x33   : > { %1515 = dma.hbm_to_vmem [thread:$0]  (!%p2102_p6), %s2599_s1, 256, %s2095_s18, [#allocation6], %s1987_s24, %s1987_s24, %s1988_s25  }
  0x34   : > { %s1658_s20 = scalar_lea.hbm %s2574_s3, 256 }
  0x35   : > { %p1659_p5 = scmp.ne.s32.totalorder %s2574_s3, %s1658_s20  ;;  %p1665_p12 = scmp.lt.u32.totalorder %s1658_s20, %s2574_s3 }
  0x37   : > { %p1661_p10 = pnand %p1659_p5, %p2118_p8 }
  0x39   : > { %p1662_p11 = pneg %p1661_p10 }
  0x3b   : > { %p1667_p13 = pnand %p1665_p12, %p1662_p11 }
  0x3d   : > { %1670 = shalt.err (!%p1667_p13)
}
  0x3e   : > { %s1671_s18 = scalar_lea.vmem %s2106_s21, 256  ;;  %p1679_p7 = scmp.lt.s32.totalorder %s2106_s21, %s2106_s21 }
  0x3f   : > { %p1672_p0 = scmp.ne.s32.totalorder %s2106_s21, %s1671_s18  ;;  %p1680_p9 = scmp.lt.s32.totalorder %s1671_s18, %s1671_s18 }
  0x41   : > { %p1674_p2 = pnand %p1672_p0, %p2118_p8  ;;  %p1681_p5 = por %p1680_p9, %p1679_p7 }
  0x43   : > { %p1675_p4 = pneg %p1674_p2 }
  0x45   : > { %p1682_p10 = pnand %p1681_p5, %p1675_p4 }
  0x47   : > { %1685 = shalt.err (!%p1682_p10)
}
  0x48   : > { %1521 = dma.hbm_to_vmem [thread:$0]  (!%p2102_p6), %s2574_s3, 256, %s2106_s21, [#allocation9], %s1987_s24, %s1987_s24, %s1988_s25  }
  0x49   : > { %s1686_s27 = scalar_lea.hbm %s2576_s5, 256 }
  0x4a   : > { %p1687_p11 = scmp.ne.s32.totalorder %s2576_s5, %s1686_s27  ;;  %p1693_p0 = scmp.lt.u32.totalorder %s1686_s27, %s2576_s5 }
  0x4c   : > { %p1689_p12 = pnand %p1687_p11, %p2118_p8 }
  0x4e   : > { %p1690_p13 = pneg %p1689_p12 }
  0x50   : > { %p1695_p2 = pnand %p1693_p0, %p1690_p13 }
  0x52   : > { %1698 = shalt.err (!%p1695_p2)
}
  0x53   : > { %s1699_s18 = scalar_lea.vmem %s348_s23, 256  ;;  %p1707_p5 = scmp.lt.s32.totalorder %s348_s23, %s348_s23 }
  0x54   : > { %p1700_p4 = scmp.ne.s32.totalorder %s348_s23, %s1699_s18  ;;  %p1708_p10 = scmp.lt.s32.totalorder %s1699_s18, %s1699_s18 }
  0x56   : > { %p1702_p7 = pnand %p1700_p4, %p2118_p8  ;;  %p1709_p1 = por %p1708_p10, %p1707_p5 }
  0x58   : > { %p1703_p9 = pneg %p1702_p7 }
  0x5a   : > { %p1710_p3 = pnand %p1709_p1, %p1703_p9 }
  0x5c   : > { %1713 = shalt.err (!%p1710_p3)
}
  0x5d   : > { %1527 = dma.hbm_to_vmem [thread:$0]  (!%p2102_p6), %s2576_s5, 256, %s348_s23, [#allocation12], %s1987_s24, %s1987_s24, %s1988_s25  }
  0x5e   : > { %s1989_s8 = smov [#allocation7]   ;;  %s1990_s26 = smov [#allocation10]  }
  0x5f   : > { %s313_s9 = sshll.u32 %s1989_s8, 4  ;;  %s337_s27 = sshll.u32 %s1990_s26, 4  ;;  %s314_s9 = int_to_ptr.vmem [resolvable:$true] %s313_s9  ;;  %s338_s27 = int_to_ptr.vmem [resolvable:$true] %s337_s27 }
  0x60   : > { %s1714_s20 = scalar_lea.hbm %s2573_s2, 16 }
  0x61   : > { %p1715_p1 = scmp.ne.s32.totalorder %s2573_s2, %s1714_s20  ;;  %p1721_p12 = scmp.lt.u32.totalorder %s1714_s20, %s2573_s2 }
  0x63   : > { %p1717_p3 = pnand %p1715_p1, %p2118_p8 }
  0x65   : > { %p1718_p11 = pneg %p1717_p3 }
  0x67   : > { %p1723_p13 = pnand %p1721_p12, %p1718_p11 }
  0x69   : > { %1726 = shalt.err (!%p1723_p13)
}
  0x6a   : > { %s1727_s23 = scalar_lea.vmem %s314_s9, 16  ;;  %s1734_s24 = scalar_lea.vmem %s314_s9, 32 }
  0x6b   : > { %p1728_p0 = scmp.ne.s32.totalorder %s314_s9, %s1727_s23  ;;  %p1735_p7 = scmp.lt.s32.totalorder %s314_s9, %s314_s9 }
  0x6c   : > { %p1736_p9 = scmp.lt.s32.totalorder %s1734_s24, %s1727_s23 }
  0x6d   : > { %p1730_p2 = pnand %p1728_p0, %p2118_p8 }
  0x6e   : > { %p1737_p5 = por %p1736_p9, %p1735_p7 }
  0x6f   : > { %p1731_p4 = pneg %p1730_p2 }
  0x71   : > { %p1738_p10 = pnand %p1737_p5, %p1731_p4 }
  0x73   : > { %1741 = shalt.err (!%p1738_p10)
}
  0x74   : > { %1518 = dma.hbm_to_vmem [thread:$0]  (!%p2102_p6), %s2573_s2, 16, %s314_s9, [#allocation6]  }
  0x75   : > { %s1742_s26 = scalar_lea.hbm %s2575_s4, 16 }
  0x76   : > { %p1743_p1 = scmp.ne.s32.totalorder %s2575_s4, %s1742_s26  ;;  %p1749_p12 = scmp.lt.u32.totalorder %s1742_s26, %s2575_s4 }
  0x78   : > { %p1745_p3 = pnand %p1743_p1, %p2118_p8 }
  0x7a   : > { %p1746_p11 = pneg %p1745_p3 }
  0x7c   : > { %p1751_p13 = pnand %p1749_p12, %p1746_p11 }
  0x7e   : > { %1754 = shalt.err (!%p1751_p13)
}
  0x7f   : > { %s1755_s18 = scalar_lea.vmem %s338_s27, 16  ;;  %s1762_s9 = scalar_lea.vmem %s338_s27, 32 }
  0x80   : > { %p1756_p0 = scmp.ne.s32.totalorder %s338_s27, %s1755_s18  ;;  %p1763_p7 = scmp.lt.s32.totalorder %s338_s27, %s338_s27 }
  0x81   : > { %p1764_p9 = scmp.lt.s32.totalorder %s1762_s9, %s1755_s18 }
  0x82   : > { %p1758_p2 = pnand %p1756_p0, %p2118_p8 }
  0x83   : > { %p1765_p5 = por %p1764_p9, %p1763_p7 }
  0x84   : > { %p1759_p4 = pneg %p1758_p2 }
  0x86   : > { %p1766_p10 = pnand %p1765_p5, %p1759_p4 }
  0x88   : > { %1769 = shalt.err (!%p1766_p10)
}
  0x89   : > { %1524 = dma.hbm_to_vmem [thread:$0]  (!%p2102_p6), %s2575_s4, 16, %s338_s27, [#allocation9]  }
  0x8a   : > { %s1991_s24 = smov [#allocation13]   ;;  %s1770_s8 = scalar_lea.hbm %s2577_s6, 16 }
  0x8b   : > { %s361_s25 = sshll.u32 %s1991_s24, 4  ;;  %p1771_p1 = scmp.ne.s32.totalorder %s2577_s6, %s1770_s8  ;;  %s362_s25 = int_to_ptr.vmem [resolvable:$true] %s361_s25 }
  0x8c   : > { %p1777_p12 = scmp.lt.u32.totalorder %s1770_s8, %s2577_s6 }
  0x8d   : > { %p1773_p3 = pnand %p1771_p1, %p2118_p8 }
  0x8f   : > { %p1774_p11 = pneg %p1773_p3 }
  0x91   : > { %p1779_p13 = pnand %p1777_p12, %p1774_p11 }
  0x93   : > { %1782 = shalt.err (!%p1779_p13)
}
  0x94   : > { %s1783_s27 = scalar_lea.vmem %s362_s25, 16  ;;  %s1790_s22 = scalar_lea.vmem %s362_s25, 32 }
  0x95   : > { %p1784_p0 = scmp.ne.s32.totalorder %s362_s25, %s1783_s27  ;;  %p1791_p7 = scmp.lt.s32.totalorder %s362_s25, %s362_s25 }
  0x96   : > { %p1792_p9 = scmp.lt.s32.totalorder %s1790_s22, %s1783_s27 }
  0x97   : > { %p1786_p2 = pnand %p1784_p0, %p2118_p8 }
  0x98   : > { %p1793_p5 = por %p1792_p9, %p1791_p7 }
  0x99   : > { %p1787_p4 = pneg %p1786_p2 }
  0x9b   : > { %p1794_p10 = pnand %p1793_p5, %p1787_p4 }
  0x9d   : > { %1797 = shalt.err (!%p1794_p10)
}
  0x9e   : > { %1530 = dma.hbm_to_vmem [thread:$0]  (!%p2102_p6), %s2577_s6, 16, %s362_s25, [#allocation12]  }
  0x9f   : > { %s2586_s29 = sadd.s32 4294967294, %s1982_s14   ;;  %s44_s21 = sadd.s32 1, %s1978_s13 }
  0xa0   : > { %p46_p8 = scmp.ge.s32.totalorder %s44_s21, 2  ;;  %s53_s19 = sadd.s32 1, %s1970_s11 }
  0xa1   : > { %p60_p1 = scmp.ne.s32.totalorder %s1970_s11, %s1966_s10  ;;  %p61_p3 = scmp.eq.s32.totalorder %s1982_s14, 0 }
  0xa2   : > { %s2632_s21 = smov (%p46_p8, %s44_s21), 0  ;;  %p66_p12 = scmp.ne.s32.totalorder %s1966_s10, %s1962_s30 }
  0xa3   : > { %p2252_p11 = por %p61_p3, %p60_p1  ;;  %s48_s24 = ssub.s32 %s1978_s13, %s2632_s21 }
  0xa4   : > { %p218_p6 = scmp.eq.s32.totalorder %s2086_s15, 1  ;;  %p51_p13 = scmp.eq.s32.totalorder %s48_s24, 0 }
  0xa5   : > { %p2602_p0 = scmp.eq.s32.totalorder %s2086_s15, 0  ;;  %p224_p7 = scmp.eq.s32.totalorder %s2586_s29, 1 }
  0xa6   : > { %p2267_p4 = por %p218_p6, %p60_p1  ;;  %p1551_p5 = scmp.lt.s32.totalorder %s1982_s14, 2 }
  0xa7   : > { %p2263_p2 = por %p2602_p0, %p66_p12  ;;  %p2276_p9 = por %p224_p7, %p66_p12 }
  0xa8   : > { %s2604_s7 = scalar_select %p2267_p4, 1, 0 }
  0xa9   : > { %s2274_s1 = scalar_select %p51_p13, %s1970_s11, %s53_s19  }
  0xaa   : > { %s2605_s8 = scalar_select %p2276_p9, 1, 0 }
  0xab   : > { %s372_s26 = sand.u32 1, %s1970_s11   ;;  %s1403_s28 = sshll.u32 %s1978_s13, 7 }
  0xac   : > { %s1402_s17 = sshll.u32 %s372_s26, 3  ;;  %s2606_s0 = sld [smem:[#allocation24_spill]] }
  0xad   : > { %s376_s18 = scalar_lea.vmem [#allocation2], %s1402_s17  ;;  %p2290_p10 = pnand %p1551_p5, %p2252_p11 }
  0xae   : > { %s384_s9 = sshll.u32 %s376_s18, 4  ;;  %s373_s24 = scalar_lea.sflag [#allocation3], %s372_s26  ;;  %s2294_s9 = int_to_ptr.vmem [resolvable:$true] %s384_s9 }
  0xaf   : > { %p1800_p1 = pneg %p2290_p10 }
  0xb2   : > { %s2286_s22 = scalar_lea.hbm %s2606_s0, %s1403_s28  ;;  %s1803_s23 = scalar_lea.hbm %s2606_s0, 256 }
  0xb3   : > { %s1798_s29 = scalar_lea.hbm %s2286_s22, 128  ;;  %p1804_p11 = scmp.lt.u32.totalorder %s2286_s22, %s2606_s0 }
  0xb4   : > { %p1799_p8 = scmp.ne.s32.totalorder %s2286_s22, %s1798_s29  ;;  %p1805_p6 = scmp.lt.u32.totalorder %s1803_s23, %s1798_s29 }
  0xb5   : > { %p1807_p0 = scmp.lt.u32.totalorder %s1798_s29, %s2286_s22 }
  0xb6   : > { %p1801_p3 = pnand %p1800_p1, %p1799_p8  ;;  %p1806_p13 = por %p1805_p6, %p1804_p11 }
  0xb8   : > { %p1802_p12 = pneg %p1801_p3  ;;  %p1808_p7 = por %p1807_p0, %p1806_p13 }
  0xba   : > { %p1809_p5 = pnand %p1808_p7, %p1802_p12 }
  0xbc   : > { %1812 = shalt.err (!%p1809_p5)
}
  0xbd   : > { %s1813_s26 = scalar_lea.vmem %s2294_s9, 128  ;;  %s1992_s18 = smov [#allocation2]  }
  0xbe   : > { %p1814_p8 = scmp.ne.s32.totalorder %s2294_s9, %s1813_s26  ;;  %s1818_s28 = sshll.u32 %s1992_s18, 4  ;;  %s1819_s28 = int_to_ptr.vmem [resolvable:$false] %s1818_s28 }
  0xbf   : > { %s1820_s17 = scalar_lea.vmem %s1819_s28, 256  ;;  %p1821_p4 = scmp.lt.s32.totalorder %s2294_s9, %s1819_s28 }
  0xc0   : > { %p1816_p3 = pnand %p1814_p8, %p1800_p1  ;;  %p1822_p11 = scmp.lt.s32.totalorder %s1820_s17, %s1813_s26 }
  0xc2   : > { %p1817_p9 = pneg %p1816_p3  ;;  %p1823_p6 = por %p1822_p11, %p1821_p4 }
  0xc4   : > { %p1824_p13 = pnand %p1823_p6, %p1817_p9 }
  0xc6   : > { %1827 = shalt.err (!%p1824_p13)
}
  0xc7   : > { %1534 = dma.hbm_to_vmem [thread:$0]  (!%p2290_p10), %s2286_s22, 128, %s2294_s9, %s373_s24  }
  0xc8   : > { %p2608_p12 = scmp.ne.s32.totalorder %s2597_s16, 0 }
  0xc9   : > { %s2324_s29 = sand.u32 (!%p2608_p12), 1, %s1966_s10  }
  0xca   : > { %393 = sbr.rel (%p2608_p12) target bundleno = 660 (0x294), region = 48  ;;  %s1405_s23 = sshll.u32 (!%p2608_p12), %s2324_s29, 3 }
  0xcb   : > { %s396_s20 = scalar_lea.sflag (!%p2608_p12), [#allocation3], %s2324_s29  ;;  %s399_s27 = scalar_lea.vmem (!%p2608_p12), [#allocation2], %s1405_s23 }
  0xd1   : > { %1937 = dma.done.wait (%p2263_p2), %s396_s20, 128  }
  0xd2   : > { %1939 = vsyncadd (%p2263_p2), %s396_s20, 4294967168  ;;  %p2609_p4 = scmp.eq.s32.totalorder %s2086_s15, 0 }
  0xd4   : > { %1941 = dma.done.wait (%p2609_p4), [#allocation6], 272   ;;  %p2610_p9 = pmov %p2609_p4 }
  0xd5   : > { %p2611_p10 = pmov %p2609_p4 }
  0xd6   : > { %1943 = vsyncadd (%p2610_p9), [#allocation6], 4294967024 }
  0xd7   : > { %1945 = dma.done.wait (%p2611_p10), [#allocation9], 272   ;;  %p2612_p1 = pmov %p2609_p4 }
  0xd9   : > { %1947 = vsyncadd (%p2612_p1), [#allocation9], 4294967024  ;;  %p2613_p0 = pmov %p2612_p1 }
  0xdb   : > { %1949 = dma.done.wait (%p2613_p0), [#allocation12], 272   ;;  %p2614_p7 = pmov %p2613_p0 }
  0xdc   : > { %v1993_v0 = vmov 0.0   ;;  %vm1994_vm0 = vmmov 0   ;;  %v1624_v1 = vld [vmem:[#allocation8] sm:$0xff]   ;;  %v1625_v2 = vld [vmem:[#allocation5] sm:$0xff]   ;;  %v1627_v4 = vld [vmem:[#allocation5 + $0x8] sm:$0xff]   ;;  %vm494_vm1 = vcmask 261120   ;;  %v553_v29 = vlaneseq }
  0xdd   : > { %1951 = vsyncadd (%p2614_p7), [#allocation12], 4294967024  ;;  %1464 = vmatprep.subr.bf16.mxu1 %v1993_v0  ;;  %1456 = vmatprep.subr.bf16.mxu0 %v1993_v0  ;;  %v1626_v3 = vld [vmem:[#allocation8 + $0x8] sm:$0xff]   ;;  %v1628_v7 = vld [vmem:[#allocation11] sm:$0xff]   ;;  %s1995_s16 = smov 104   ;;  %s1996_s25 = smov 120  }
  0xde   : > { %1468 = vmatprep.mubr.msk.bf16.mxu1 %vm1994_vm0, %v1993_v0  ;;  %1460 = vmatprep.mubr.msk.bf16.mxu0 %vm1994_vm0, %v1993_v0  ;;  %v469_v5 = vld [vmem:[%s399_s27] sm:$0xff]  ;;  %v1421_v9 = vld [vmem:[#allocation10] ss:$0 sm:$0xff]  ;;  %s1997_s22 = smov 112   ;;  %v1998_v27 = vmov 1983009808  }
  0xdf   : > { %1465 = vmatpush3.bf16.msra.mxu1 %v1624_v1  ;;  %1457 = vmatpush3.bf16.msra.mxu0 %v1625_v2  ;;  %v470_v6 = vpack.c.bf16 %v469_v5, %v469_v5  ;;  %v1629_v8 = vld [vmem:[#allocation11 + $0x8] sm:$0xff]   ;;  %v1427_v21 = vld [vmem:[#allocation13] ss:$0 sm:$0xff]  ;;  %v551_v28 = vunpack.c.l.s4 %v1998_v27  ;;  %v1999_v30 = vmov 1934713408   ;;  %v554_v33 = vshrl.u32 %v553_v29, 7 }
  0xe0   : > { %1466 = vmatprep.subr.bf16.mxu1 %v1993_v0  ;;  %1458 = vmatprep.subr.bf16.mxu0 %v1993_v0  ;;  %v1415_v11 = vld [vmem:[#allocation7] ss:$0 sm:$0xff]  ;;  %v583_v31 = vunpack.c.l.s4 %v1999_v30  ;;  %vm688_vm2 = vcmask 60416   ;;  %s2379_s9 = sshll.u32 %s2324_s29, 4  ;;  %s1132_s19 = sand.u32 1, %s2086_s15  }
  0xe1   : > { %v552_v32 = vunpack.c.0.s8 %v551_v28  ;;  %s2391_s24 = sshll.u32 %s1974_s12, 8  ;;  %s460_s26 = scalar_lea.vmem [#allocation15], %s2379_s9 }
  0xe2   : > { %v584_v36 = vunpack.c.0.s8 %v583_v31  ;;  %s1169_s18 = sshll.u32 %s460_s26, 4  ;;  %s2615_s17 = sld [smem:[#allocation27_spill]]  ;;  %s2400_s18 = int_to_ptr.vmem [resolvable:$true] %s1169_s18 }
  0xe3   : > { %1467 = vmatpush3.bf16.msra.mxu1 %v1626_v3  ;;  %1459 = vmatpush3.bf16.msra.mxu0 %v1627_v4  ;;  %v2352_v37 = vsub.s32 %v552_v32, %v554_v33  ;;  %s2415_s20 = scalar_lea.vmem [#allocation14], %s2379_s9  ;;  %p2616_p5 = scmp.ne.s32.totalorder %s2604_s7, 0 }
  0xe4   : > { %1472 = vmatprep.subr.bf16.mxu0 %v1993_v0  ;;  %v2354_v44 = vsub.s32 %v584_v36, %v554_v33 }
  0xe6   : > { %1469 = vmatmul.mubr.msk.bf16.vlgmr.msra.gmra.mrb[0].mxu1 %vm494_vm1, %v470_v6  ;;  %1461 = vmatmul.mubr.msk.bf16.vlgmr.msra.gmra.mrb[0].mxu0 %vm494_vm1, %v470_v6 }
  0xe7   : > { %1473 = vmatpush3.bf16.msra.mxu0 %v1628_v7  ;;  %1476 = vmatprep.mubr.msk.bf16.mxu0 %vm1994_vm0, %v1993_v0 }
  0xe8   : > { %1474 = vmatprep.subr.bf16.mxu0 %v1993_v0  ;;  %s2398_s23 = scalar_lea.hbm %s2615_s17, %s2391_s24 }
  0xeb   : > { %1475 = vmatpush3.bf16.msra.mxu0 %v1629_v8 }
  0xee   : > { %1477 = vmatmul.mubr.msk.bf16.vlgmr.msra.gmra.mrb[4].mxu0 %vm494_vm1, %v470_v6 }
 0x1b9   : > { %v750_v10 = vpop.f32.mrb[0].mxu1  ;;  %v532_v13 = vpop.f32.mrb[0].mxu0 }
 0x1ba   : > { %v751_v12 = vadd.f32 %v1421_v9, %v750_v10  ;;  %v1470_v14 = vpop.f32.mrb[1].mxu1  ;;  %v1462_v15 = vpop.f32.mrb[1].mxu0  ;;  %v533_v17 = vadd.f32 %v1415_v11, %v532_v13 }
 0x1bb   : > { %v753_v16 = vpop.f32.mrb[2].mxu1  ;;  %v535_v18 = vpop.f32.mrb[2].mxu0 }
 0x1bc   : > { %763 = vrot.lane.b32.xlu1 %v751_v12, %s1995_s16  ;;  %757 = vrot.lane.b32.xlu0 %v751_v12, %s1996_s25  ;;  %v1471_v19 = vpop.f32.mrb[3].mxu1  ;;  %v1463_v20 = vpop.f32.mrb[3].mxu0 }
 0x1c0   : > { %760 = vrot.lane.b32.xlu0 %v751_v12, %s1997_s22  ;;  %539 = vrot.lane.b32.xlu1 %v533_v17, %s1996_s25 }
 0x1c1   : > { %v967_v22 = vpop.f32.mrb[4].mxu0 }
 0x1c2   : > { %v1478_v23 = vpop.f32.mrb[5].mxu0  ;;  %v2347_v24 = vadd.f32 %v1427_v21, %v967_v22 }
 0x1c3   : > { %v970_v25 = vpop.f32.mrb[6].mxu0 }
 0x1c4   : > { %542 = vrot.lane.b32.xlu0 %v533_v17, %s1997_s22  ;;  %545 = vrot.lane.b32.xlu1 %v533_v17, %s1995_s16  ;;  %v1479_v26 = vpop.f32.mrb[7].mxu0 }
 0x1c8   : > { %977 = vrot.lane.b32.xlu1 %v2347_v24, %s1997_s22  ;;  %974 = vrot.lane.b32.xlu0 %v2347_v24, %s1996_s25  ;;  %s1828_s25 = scalar_lea.vmem %s2400_s18, 256  ;;  %s2000_s22 = smov [#allocation15]  }
 0x1c9   : > { %p1829_p2 = scmp.ne.s32.totalorder %s2400_s18, %s1828_s25  ;;  %s1832_s12 = sshll.u32 %s2000_s22, 4  ;;  %s1833_s12 = int_to_ptr.vmem [resolvable:$false] %s1832_s12 }
 0x1ca   : > { %p1835_p11 = scmp.lt.s32.totalorder %s2400_s18, %s1833_s12 }
 0x1cb   : > { %p1830_p8 = pnand %p1829_p2, %p2616_p5 }
 0x1cc   : > { %980 = vrot.lane.b32.xlu0 %v2347_v24, %s1995_s16  ;;  %s2420_s16 = scalar_lea.sflag [#allocation16], %s1132_s19 }
 0x1cd   : > { %p1831_p3 = pneg %p1830_p8 }
 0x22e   : > { %v764_v34 = vpop.permute.xlu1 %763  ;;  %v758_v35 = vpop.permute.xlu0 %757 }
 0x22f   : > { %v782_v38 = vcombine.low %v758_v35, %v764_v34  ;;  %v783_v39 = vcombine.high %v758_v35, %v764_v34 }
 0x231   : > { %v790_v45 = vrot.slane %v782_v38, %v2352_v37  ;;  %v797_v46 = vrot.slane %v783_v39, %v2352_v37 }
 0x232   : > { %v761_v40 = vpop.permute.xlu0 %760  ;;  %v540_v41 = vpop.permute.xlu1 %539 }
 0x233   : > { %v766_v42 = vcombine.low %v751_v12, %v761_v40  ;;  %v767_v43 = vcombine.high %v751_v12, %v761_v40 }
 0x235   : > { %v774_v47 = vrot.slane %v766_v42, %v2352_v37  ;;  %v781_v48 = vrot.slane %v767_v43, %v2352_v37 }
 0x236   : > { %v543_v49 = vpop.permute.xlu0 %542  ;;  %v546_v50 = vpop.permute.xlu1 %545 }
 0x237   : > { %v798_v51 = vcombine.low %v774_v47, %v790_v45  ;;  %v799_v52 = vcombine.high %v774_v47, %v790_v45  ;;  %v814_v53 = vcombine.low %v781_v48, %v797_v46  ;;  %v815_v54 = vcombine.high %v781_v48, %v797_v46 }
 0x238   : > { %v548_v55 = vcombine.low %v533_v17, %v543_v49  ;;  %v549_v56 = vcombine.high %v533_v17, %v543_v49  ;;  %v564_v57 = vcombine.low %v540_v41, %v546_v50  ;;  %v565_v58 = vcombine.high %v540_v41, %v546_v50 }
 0x239   : > { %v806_v59 = vrot.slane %v798_v51, %v2354_v44  ;;  %v813_v60 = vrot.slane %v799_v52, %v2354_v44  ;;  %v822_v61 = vrot.slane %v814_v53, %v2354_v44  ;;  %v829_v62 = vrot.slane %v815_v54, %v2354_v44 }
 0x23a   : > { %v556_v63 = vrot.slane %v548_v55, %v2352_v37  ;;  %v563_v0 = vrot.slane %v549_v56, %v2352_v37  ;;  %v572_v1 = vrot.slane %v564_v57, %v2352_v37  ;;  %v579_v2 = vrot.slane %v565_v58, %v2352_v37  ;;  %v2376_v19 = vpop.permute.xlu0 %974  ;;  %v978_v47 = vpop.permute.xlu1 %977 }
 0x23b   : > { %v834_v3 = vcombine.low %v806_v59, %v813_v60  ;;  %v1425_v4 = vcombine.high %v806_v59, %v813_v60  ;;  %v850_v5 = vcombine.low %v822_v61, %v829_v62  ;;  %v1426_v6 = vcombine.high %v822_v61, %v829_v62 }
 0x23c   : > { %v580_v7 = vcombine.low %v556_v63, %v572_v1  ;;  %v581_v8 = vcombine.high %v556_v63, %v572_v1  ;;  %v596_v9 = vcombine.low %v563_v0, %v579_v2  ;;  %v597_v10 = vcombine.high %v563_v0, %v579_v2 }
 0x23d   : > { %v841_v11 = vrot.slane %v834_v3, %v2352_v37  ;;  %v849_v12 = vrot.slane %v1425_v4, %v2352_v37  ;;  %v857_v13 = vrot.slane %v850_v5, %v2352_v37  ;;  %v865_v14 = vrot.slane %v1426_v6, %v2352_v37 }
 0x23e   : > { %v588_v15 = vrot.slane %v580_v7, %v2354_v44  ;;  %v595_v16 = vrot.slane %v581_v8, %v2354_v44  ;;  %v604_v17 = vrot.slane %v596_v9, %v2354_v44  ;;  %v611_v18 = vrot.slane %v597_v10, %v2354_v44  ;;  %v981_v48 = vpop.permute.xlu0 %980 }
 0x23f   : > { %v866_v20 = vcombine.low %v841_v11, %v849_v12  ;;  %v867_v21 = vcombine.high %v841_v11, %v849_v12  ;;  %v882_v22 = vcombine.low %v857_v13, %v865_v14  ;;  %v883_v23 = vcombine.high %v857_v13, %v865_v14 }
 0x240   : > { %v616_v25 = vcombine.low %v588_v15, %v595_v16  ;;  %v1419_v26 = vcombine.high %v588_v15, %v595_v16  ;;  %v632_v27 = vcombine.low %v604_v17, %v611_v18  ;;  %v1420_v28 = vcombine.high %v604_v17, %v611_v18 }
 0x241   : > { %v874_v29 = vrot.slane %v866_v20, %v2354_v44  ;;  %v881_v30 = vrot.slane %v867_v21, %v2354_v44  ;;  %v890_v31 = vrot.slane %v882_v22, %v2354_v44  ;;  %v897_v32 = vrot.slane %v883_v23, %v2354_v44 }
 0x242   : > { %v623_v33 = vrot.slane %v616_v25, %v2352_v37  ;;  %v631_v34 = vrot.slane %v1419_v26, %v2352_v37  ;;  %v639_v35 = vrot.slane %v632_v27, %v2352_v37  ;;  %v647_v36 = vrot.slane %v1420_v28, %v2352_v37 }
 0x243   : > { %v898_v38 = vcombine.low %v874_v29, %v890_v31  ;;  %v899_v39 = vcombine.high %v874_v29, %v890_v31  ;;  %v900_v40 = vcombine.low %v881_v30, %v897_v32  ;;  %v901_v41 = vcombine.high %v881_v30, %v897_v32 }
 0x244   : > { %v648_v42 = vcombine.low %v623_v33, %v631_v34  ;;  %v649_v43 = vcombine.high %v623_v33, %v631_v34  ;;  %v664_v45 = vcombine.low %v639_v35, %v647_v36  ;;  %v665_v46 = vcombine.high %v639_v35, %v647_v36 }
 0x245   : > { %v902_v49 = vpack.c.bf16 %v898_v38, %v898_v38  ;;  %v903_v50 = vpack.c.bf16 %v899_v39, %v899_v39  ;;  %v904_v51 = vpack.c.bf16 %v900_v40, %v900_v40  ;;  %v905_v52 = vpack.c.bf16 %v901_v41, %v901_v41 }
 0x246   : > { %v656_v53 = vrot.slane %v648_v42, %v2354_v44  ;;  %v663_v54 = vrot.slane %v649_v43, %v2354_v44  ;;  %v672_v55 = vrot.slane %v664_v45, %v2354_v44  ;;  %v679_v56 = vrot.slane %v665_v46, %v2354_v44 }
 0x247   : > { %v983_v57 = vcombine.low %v2347_v24, %v978_v47  ;;  %v984_v58 = vcombine.high %v2347_v24, %v978_v47  ;;  %v999_v59 = vcombine.low %v2376_v19, %v981_v48  ;;  %v1000_v60 = vcombine.high %v2376_v19, %v981_v48  ;;  %906 = vst.msk [vmem:[%s460_s26] sm:$0xf] %vm688_vm2, %v902_v49 }
 0x248   : > { %907 = vst.msk [vmem:[%s460_s26 + $0x4] sm:$0xf] %vm688_vm2, %v903_v50  ;;  %908 = vst.msk [vmem:[%s460_s26 + $0x8] sm:$0xf] %vm688_vm2, %v904_v51  ;;  %v680_v61 = vcombine.low %v656_v53, %v672_v55  ;;  %v681_v24 = vcombine.high %v656_v53, %v672_v55  ;;  %v682_v62 = vcombine.low %v663_v54, %v679_v56 }
 0x249   : > { %909 = vst.msk [vmem:[%s460_s26 + $0xc] sm:$0xf] %vm688_vm2, %v905_v52  ;;  %v683_v63 = vcombine.high %v663_v54, %v679_v56  ;;  %s1834_s26 = scalar_lea.vmem %s1833_s12, 512 }
 0x24a   : > { %p1836_p6 = scmp.lt.s32.totalorder %s1834_s26, %s1828_s25 }
 0x24c   : > { %p1837_p13 = por %p1836_p6, %p1835_p11 }
 0x24e   : > { %p1838_p12 = pnand %p1837_p13, %p1831_p3 }
 0x250   : > { %1841 = shalt.err (!%p1838_p12)
}
 0x251   : > { %s1842_s15 = scalar_lea.hbm %s2398_s23, 256  ;;  %s1846_s22 = scalar_lea.hbm %s2615_s17, 512 }
 0x252   : > { %p1843_p4 = scmp.ne.s32.totalorder %s2398_s23, %s1842_s15  ;;  %p1847_p1 = scmp.lt.u32.totalorder %s2398_s23, %s2615_s17 }
 0x253   : > { %p1848_p0 = scmp.lt.u32.totalorder %s1846_s22, %s1842_s15  ;;  %p1850_p2 = scmp.lt.u32.totalorder %s1842_s15, %s2398_s23 }
 0x254   : > { %p1844_p9 = pnand %p1843_p4, %p2616_p5 }
 0x255   : > { %p1849_p7 = por %p1848_p0, %p1847_p1 }
 0x256   : > { %p1845_p10 = pneg %p1844_p9 }
 0x257   : > { %p1851_p8 = por %p1850_p2, %p1849_p7 }
 0x259   : > { %p1852_p3 = pnand %p1851_p8, %p1845_p10 }
 0x25b   : > { %1855 = shalt.err (!%p1852_p3)
}
 0x25c   : > { %s2588_s25 = smov 64   ;;  %s2590_s26 = smov 4   ;;  %v991_v0 = vrot.slane %v983_v57, %v2352_v37  ;;  %v998_v1 = vrot.slane %v984_v58, %v2352_v37  ;;  %v1007_v2 = vrot.slane %v999_v59, %v2352_v37  ;;  %v1014_v3 = vrot.slane %v1000_v60, %v2352_v37 }
 0x25d   : > { %1507 = dma.vmem_to_hbm [thread:$0]  (%p2616_p5), %s2400_s18, 256, %s2398_s23, %s2420_s16, %s2588_s25, %s2588_s25, %s2590_s26   ;;  %v684_v4 = vpack.c.bf16 %v680_v61, %v680_v61  ;;  %v685_v5 = vpack.c.bf16 %v681_v24, %v681_v24  ;;  %v686_v6 = vpack.c.bf16 %v682_v62, %v682_v62  ;;  %v687_v7 = vpack.c.bf16 %v683_v63, %v683_v63 }
 0x25e   : > { %s2617_s19 = sld [smem:[#allocation26_spill]]  ;;  %s2618_s23 = sshll.u32 %s2415_s20, 4  ;;  %v1015_v8 = vcombine.low %v991_v0, %v1007_v2  ;;  %v1016_v9 = vcombine.high %v991_v0, %v1007_v2  ;;  %v1031_v10 = vcombine.low %v998_v1, %v1014_v3  ;;  %v1032_v11 = vcombine.high %v998_v1, %v1014_v3  ;;  %s2459_s23 = int_to_ptr.vmem [resolvable:$true] %s2618_s23 }
 0x25f   : > { %689 = vst.msk [vmem:[%s2415_s20] sm:$0xf] %vm688_vm2, %v684_v4  ;;  %690 = vst.msk [vmem:[%s2415_s20 + $0x4] sm:$0xf] %vm688_vm2, %v685_v5  ;;  %s1856_s22 = scalar_lea.vmem %s2459_s23, 256  ;;  %s2003_s12 = smov [#allocation14]  }
 0x260   : > { %691 = vst.msk [vmem:[%s2415_s20 + $0x8] sm:$0xf] %vm688_vm2, %v686_v6  ;;  %692 = vst.msk [vmem:[%s2415_s20 + $0xc] sm:$0xf] %vm688_vm2, %v687_v7  ;;  %v1023_v12 = vrot.slane %v1015_v8, %v2354_v44  ;;  %v1030_v13 = vrot.slane %v1016_v9, %v2354_v44  ;;  %v1039_v14 = vrot.slane %v1031_v10, %v2354_v44  ;;  %p1857_p11 = scmp.ne.s32.totalorder %s2459_s23, %s1856_s22  ;;  %s1860_s27 = sshll.u32 %s2003_s12, 4  ;;  %s1861_s27 = int_to_ptr.vmem [resolvable:$false] %s1860_s27 }
 0x261   : > { %v1046_v15 = vrot.slane %v1032_v11, %v2354_v44  ;;  %s1862_s15 = scalar_lea.vmem %s1861_s27, 512  ;;  %p1863_p12 = scmp.lt.s32.totalorder %s2459_s23, %s1861_s27 }
 0x262   : > { %p1858_p6 = pnand %p1857_p11, %p2616_p5  ;;  %p1864_p4 = scmp.lt.s32.totalorder %s1862_s15, %s1856_s22 }
 0x264   : > { %s2455_s18 = scalar_lea.hbm %s2617_s19, %s2391_s24  ;;  %p1859_p13 = pneg %p1858_p6 }
 0x265   : > { %p1865_p9 = por %p1864_p4, %p1863_p12 }
 0x267   : > { %p1866_p10 = pnand %p1865_p9, %p1859_p13 }
 0x269   : > { %1869 = shalt.err (!%p1866_p10)
}
 0x26a   : > { %s1870_s20 = scalar_lea.hbm %s2455_s18, 256  ;;  %s1874_s12 = scalar_lea.hbm %s2617_s19, 512 }
 0x26b   : > { %p1871_p1 = scmp.ne.s32.totalorder %s2455_s18, %s1870_s20  ;;  %p1875_p2 = scmp.lt.u32.totalorder %s2455_s18, %s2617_s19 }
 0x26c   : > { %p1876_p8 = scmp.lt.u32.totalorder %s1874_s12, %s1870_s20  ;;  %p1878_p11 = scmp.lt.u32.totalorder %s1870_s20, %s2455_s18 }
 0x26d   : > { %p1872_p0 = pnand %p1871_p1, %p2616_p5 }
 0x26e   : > { %p1877_p3 = por %p1876_p8, %p1875_p2 }
 0x26f   : > { %p1873_p7 = pneg %p1872_p0 }
 0x270   : > { %p1879_p6 = por %p1878_p11, %p1877_p3 }
 0x272   : > { %p1880_p13 = pnand %p1879_p6, %p1873_p7 }
 0x274   : > { %1883 = shalt.err (!%p1880_p13)
}
 0x275   : > { %s2619_s22 = smov 4   ;;  %s2620_s15 = smov 64   ;;  %v1051_v16 = vcombine.low %v1023_v12, %v1030_v13  ;;  %v1431_v17 = vcombine.high %v1023_v12, %v1030_v13  ;;  %v1067_v18 = vcombine.low %v1039_v14, %v1046_v15  ;;  %v1432_v19 = vcombine.high %v1039_v14, %v1046_v15 }
 0x276   : > { %s2621_s0 = scalar_lea.sflag [#allocation4], %s2324_s29 }
 0x277   : > { %1506 = dma.vmem_to_hbm [thread:$0]  (%p2616_p5), %s2459_s23, 256, %s2455_s18, %s2621_s0, %s2620_s15, %s2620_s15, %s2619_s22   ;;  %v1058_v20 = vrot.slane %v1051_v16, %v2352_v37  ;;  %v1066_v21 = vrot.slane %v1431_v17, %v2352_v37  ;;  %v1074_v22 = vrot.slane %v1067_v18, %v2352_v37  ;;  %v1082_v23 = vrot.slane %v1432_v19, %v2352_v37 }
 0x278   : > { %s467_s0 = scalar_lea.vmem [#allocation17], %s2379_s9  ;;  %s2622_s18 = sld [smem:[#allocation28_spill]] }
 0x279   : > { %v1083_v25 = vcombine.low %v1058_v20, %v1066_v21  ;;  %v1084_v26 = vcombine.high %v1058_v20, %v1066_v21  ;;  %v1099_v27 = vcombine.low %v1074_v22, %v1082_v23  ;;  %v1100_v28 = vcombine.high %v1074_v22, %v1082_v23  ;;  %s1186_s29 = sshll.u32 %s467_s0, 4  ;;  %s2515_s29 = int_to_ptr.vmem [resolvable:$true] %s1186_s29 }
 0x27a   : > { %s1884_s9 = scalar_lea.vmem %s2515_s29, 256 }
 0x27b   : > { %v1091_v29 = vrot.slane %v1083_v25, %v2354_v44  ;;  %v1098_v30 = vrot.slane %v1084_v26, %v2354_v44  ;;  %v1107_v31 = vrot.slane %v1099_v27, %v2354_v44  ;;  %v1114_v32 = vrot.slane %v1100_v28, %v2354_v44  ;;  %p1885_p12 = scmp.ne.s32.totalorder %s2515_s29, %s1884_s9 }
 0x27d   : > { %v1115_v33 = vcombine.low %v1091_v29, %v1107_v31  ;;  %v1116_v34 = vcombine.high %v1091_v29, %v1107_v31  ;;  %v1117_v35 = vcombine.low %v1098_v30, %v1114_v32  ;;  %v1118_v37 = vcombine.high %v1098_v30, %v1114_v32  ;;  %p1886_p4 = pnand %p1885_p12, %p2616_p5 }
 0x27e   : > { %s2513_s23 = scalar_lea.hbm %s2622_s18, %s2391_s24  ;;  %s2004_s24 = smov [#allocation17]  }
 0x27f   : > { %v1119_v36 = vpack.c.bf16 %v1115_v33, %v1115_v33  ;;  %v1120_v38 = vpack.c.bf16 %v1116_v34, %v1116_v34  ;;  %v1121_v39 = vpack.c.bf16 %v1117_v35, %v1117_v35  ;;  %v1122_v40 = vpack.c.bf16 %v1118_v37, %v1118_v37  ;;  %p1887_p9 = pneg %p1886_p4  ;;  %s1888_s28 = sshll.u32 %s2004_s24, 4  ;;  %s1889_s28 = int_to_ptr.vmem [resolvable:$false] %s1888_s28 }
 0x280   : > { %s1890_s20 = scalar_lea.vmem %s1889_s28, 512  ;;  %p1891_p10 = scmp.lt.s32.totalorder %s2515_s29, %s1889_s28 }
 0x281   : > { %1123 = vst.msk [vmem:[%s467_s0] sm:$0xf] %vm688_vm2, %v1119_v36  ;;  %1124 = vst.msk [vmem:[%s467_s0 + $0x4] sm:$0xf] %vm688_vm2, %v1120_v38  ;;  %p1892_p1 = scmp.lt.s32.totalorder %s1890_s20, %s1884_s9 }
 0x282   : > { %1125 = vst.msk [vmem:[%s467_s0 + $0x8] sm:$0xf] %vm688_vm2, %v1121_v39  ;;  %1126 = vst.msk [vmem:[%s467_s0 + $0xc] sm:$0xf] %vm688_vm2, %v1122_v40 }
 0x283   : > { %p1893_p0 = por %p1892_p1, %p1891_p10 }
 0x285   : > { %p1894_p7 = pnand %p1893_p0, %p1887_p9 }
 0x287   : > { %1897 = shalt.err (!%p1894_p7)
}
 0x288   : > { %s1898_s12 = scalar_lea.hbm %s2513_s23, 256  ;;  %s1902_s25 = scalar_lea.hbm %s2622_s18, 512 }
 0x289   : > { %p1899_p2 = scmp.ne.s32.totalorder %s2513_s23, %s1898_s12  ;;  %p1903_p11 = scmp.lt.u32.totalorder %s2513_s23, %s2622_s18 }
 0x28a   : > { %p1904_p6 = scmp.lt.u32.totalorder %s1902_s25, %s1898_s12  ;;  %p1906_p12 = scmp.lt.u32.totalorder %s1898_s12, %s2513_s23 }
 0x28b   : > { %p1900_p8 = pnand %p1899_p2, %p2616_p5 }
 0x28c   : > { %p1905_p13 = por %p1904_p6, %p1903_p11 }
 0x28d   : > { %p1901_p3 = pneg %p1900_p8 }
 0x28e   : > { %p1907_p4 = por %p1906_p12, %p1905_p13 }
 0x290   : > { %p1908_p9 = pnand %p1907_p4, %p1901_p3 }
 0x292   : > { %1911 = shalt.err (!%p1908_p9)
}
 0x293   : > { %1508 = dma.vmem_to_hbm [thread:$0]  (%p2616_p5), %s2515_s29, 256, %s2513_s23, %s2420_s16, %s2620_s15, %s2620_s15, %s2619_s22  }
 0x294 PF: > { %s1201_s9 = sand.u32 1, %s1962_s30   ;;  %p2623_p10 = scmp.ne.s32.totalorder %s2605_s8, 0 }
 0x295   : > { %p2624_p1 = scmp.ge.s32.totalorder %s1982_s14, 2  ;;  %s1202_s28 = scalar_lea.sflag [#allocation4], %s1201_s9 }
 0x297   : > { %p1536_p0 = pnand %p2624_p1, %p2623_p10 }
 0x299   : > { %1953 = dma.done.wait (!%p1536_p0), %s1202_s28, 256  }
 0x29a   : > { %1955 = vsyncadd (!%p1536_p0), %s1202_s28, 4294967040  ;;  %s2625_s7 = sadd.s32 4294967294, %s1982_s14  }
 0x29b   : > { %s1210_s20 = sand.u32 1, %s2625_s7  }
 0x29c   : > { %s1211_s12 = scalar_lea.sflag [#allocation16], %s1210_s20 }
 0x29d   : > { %1957 = dma.done.wait (!%p1536_p0), %s1211_s12, 512  }
 0x29e   : > { %1959 = vsyncadd (!%p1536_p0), %s1211_s12, 4294966784  ;;  %s32_s14 = sadd.s32 1, %s1982_s14   ;;  %s2626_s30 = smov %s1966_s10 }
 0x29f   : > { %p29_p5 = scmp.ge.s32.totalorder %s32_s14, 4   ;;  %s2627_s10 = smov %s1970_s11 }
 0x2a0   : > { %s2628_s11 = smov %s2274_s1  ;;  %s2629_s12 = smov %s1978_s13 }
 0x2a1   : > { %s2630_s13 = smov %s2632_s21  ;;  %31 = sbr.rel (!%p29_p5) target bundleno = 17 (0x11), region = 149 }
 0x2a8   :  { %1225 = vsyncpa [#allocation3], 1 }
 0x2a9   :  { %1227 = vsyncpa [#allocation3 + $0x1], 1 }
 0x2aa   :  { %1228 = vsyncpa [#allocation6], 1 }
 0x2ab   :  { %1229 = vsyncpa [#allocation9], 1 }
 0x2ac   :  { %1230 = vsyncpa [#allocation12], 1 }
 0x2ad   :  { %1231 = vsyncpa [#allocation4], 1 }
 0x2ae   :  { %1233 = vsyncpa [#allocation4 + $0x1], 1 }
 0x2af   :  { %1234 = vsyncpa [#allocation16], 1 }
 0x2b0   :  { %1236 = vsyncpa [#allocation16 + $0x1], 1 }

</bundles_post_ra>
